<compile_context>
chip_gen: v6e
topology: v6e:2x2x1
jax: 0.10.0
libtpu: 0.0.40
codegen_flags: <defaults>
</compile_context>

<pallas_src>
import jax
import jax.numpy as jnp
from jax.experimental import pallas as pl
from jax.experimental.pallas import tpu as pltpu


# -----------------------------------------------------------------------------
# Generic tiled (M,K)@(K,N)+bias Pallas kernel -- fully parallel grid.
# Used for both the hoisted input projection and the hoisted vocab projection.
# -----------------------------------------------------------------------------
def _matmul_bias_kernel(x_ref, w_ref, b_ref, o_ref):
    o_ref[...] = (jnp.dot(x_ref[...], w_ref[...],
                          preferred_element_type=jnp.float32)
                  + b_ref[...]).astype(o_ref.dtype)


def _pallas_matmul_bias(x, w, b, *, bm=256, bn=512):
    """y = x @ w + b with x:(M,K), w:(K,N), b:(1,N) -> (M,N) f32."""
    M, K = x.shape
    _, N = w.shape
    bm = min(bm, M)
    bn = min(bn, N)
    if M % bm:
        bm = M          # small / non-divisible M: use the full extent
    if N % bn:
        bn = N          # small / non-divisible N: use the full extent
    grid = (M // bm, N // bn)
    return pl.pallas_call(
        _matmul_bias_kernel,
        out_shape=jax.ShapeDtypeStruct((M, N), jnp.float32),
        grid_spec=pltpu.PrefetchScalarGridSpec(
            num_scalar_prefetch=0,
            grid=grid,
            in_specs=[
                pl.BlockSpec((bm, K), lambda i, j: (i, 0)),
                pl.BlockSpec((K, bn), lambda i, j: (0, j)),
                pl.BlockSpec((1, bn), lambda i, j: (0, j)),
            ],
            out_specs=pl.BlockSpec((bm, bn), lambda i, j: (i, j)),
        ),
        compiler_params=pltpu.CompilerParams(
            dimension_semantics=("parallel", "parallel")),
    )(x, w, b)


# -----------------------------------------------------------------------------
# Recurrent LSTM kernel: consumes precomputed x-projections, does only
# h_prev @ W_hh^T per step, processes a whole time chunk per grid iteration.
# -----------------------------------------------------------------------------
def _lstm_recurrent_kernel(xproj_ref, whh_ref, hs_ref, h_scr, c_scr):
    # Zero-initialize the recurrent state at the first chunk
    # (PyTorch forward() passes no initial state -> zeros).
    @pl.when(pl.program_id(0) == 0)
    def _():
        h_scr[...] = jnp.zeros_like(h_scr)
        c_scr[...] = jnp.zeros_like(c_scr)

    H = h_scr.shape[-1]
    whh = whh_ref[...]                  # (H, 4H), hoisted load out of the loop
    t_chunk = xproj_ref.shape[0]

    def step(t, carry):
        h_prev, c_prev = carry
        # gates = (x_t @ W_ih^T + b)   [precomputed]   +  h_prev @ W_hh^T
        gates = xproj_ref[t] + jnp.dot(h_prev, whh,
                                       preferred_element_type=jnp.float32)
        i_g = jax.nn.sigmoid(gates[:, 0 * H:1 * H])
        f_g = jax.nn.sigmoid(gates[:, 1 * H:2 * H])
        g_g = jnp.tanh(gates[:, 2 * H:3 * H])
        o_g = jax.nn.sigmoid(gates[:, 3 * H:4 * H])
        c_new = f_g * c_prev + i_g * g_g
        h_new = o_g * jnp.tanh(c_new)
        hs_ref[t] = h_new               # contiguous (B, H) store
        return (h_new, c_new)

    # h/c stay in vregs across the unrolled chunk; scratch only at boundaries.
    h_last, c_last = jax.lax.fori_loop(
        0, t_chunk, step, (h_scr[...], c_scr[...]), unroll=True)
    h_scr[...] = h_last
    c_scr[...] = c_last


def _pick_t_chunk(T, max_chunk=16):
    for c in range(min(T, max_chunk), 0, -1):
        if T % c == 0:
            return c
    return T


# -----------------------------------------------------------------------------
# Forward pass (matches DecoderRNN.forward semantics)
# -----------------------------------------------------------------------------
@jax.jit
def decoder_rnn_forward(features, captions, params):
    """features: (B, E) f32, captions: (B, Tc) int32 -> logits (B, Tc, V)."""
    # Embedding lookup + time concat (glue, done in XLA).
    emb = jnp.take(params["embedding"], captions[:, :-1], axis=0)      # (B,T-1,E)
    x = jnp.concatenate([features[:, None, :], emb], axis=1)           # (B,T,E)
    x = x.astype(jnp.float32)

    B, T, E = x.shape
    H = params["w_hh_t"].shape[0]
    V = params["w_out_t"].shape[1]

    # ---- (1) hoisted input projection: one big parallel GEMM ---------------
    # Transpose the *small* E-wide tensor to time-major for the recurrence.
    x_tm = jnp.transpose(x, (1, 0, 2)).reshape(T * B, E)               # (T*B, E)
    xproj = _pallas_matmul_bias(x_tm, params["w_ih_t"], params["b"])   # (T*B, 4H)
    xproj_tm = xproj.reshape(T, B, 4 * H)

    # ---- (2) sequential LSTM recurrence (only h @ W_hh^T per step) ---------
    t_chunk = _pick_t_chunk(T)
    hs_tm = pl.pallas_call(
        _lstm_recurrent_kernel,
        out_shape=jax.ShapeDtypeStruct((T, B, H), jnp.float32),
        grid_spec=pltpu.PrefetchScalarGridSpec(
            num_scalar_prefetch=0,
            grid=(T // t_chunk,),
            in_specs=[
                pl.BlockSpec((t_chunk, B, 4 * H), lambda i: (i, 0, 0)),  # x_proj
                pl.BlockSpec((H, 4 * H), lambda i: (0, 0)),              # W_hh^T
            ],
            out_specs=pl.BlockSpec((t_chunk, B, H), lambda i: (i, 0, 0)),
            scratch_shapes=[
                pltpu.VMEM((B, H), jnp.float32),   # h state (carried across chunks)
                pltpu.VMEM((B, H), jnp.float32),   # c state
            ],
        ),
        compiler_params=pltpu.CompilerParams(
            dimension_semantics=("arbitrary",)),   # sequential recurrence
    )(xproj_tm, params["w_hh_t"])

    # ---- (3) hoisted output projection, written batch-major ----------------
    # Only the small H-wide tensor is transposed; the big (B,T,V) logits are
    # produced directly in batch-major layout (no extra HBM round trip).
    hs_bm = jnp.transpose(hs_tm, (1, 0, 2)).reshape(B * T, H)          # (B*T, H)
    logits = _pallas_matmul_bias(hs_bm, params["w_out_t"],
                                 params["b_out"])                      # (B*T, V)
    return logits.reshape(B, T, V)
    # TODO(synk): for v7x megacore, add a 'parallel' batch-block grid axis to
    # the recurrent kernel with per-block h/c scratch.


# -----------------------------------------------------------------------------
# Pure-JAX reference (lax.scan LSTM) for correctness checking
# -----------------------------------------------------------------------------
def decoder_rnn_reference(features, captions, params):
    emb = jnp.take(params["embedding"], captions[:, :-1], axis=0)
    x = jnp.concatenate([features[:, None, :], emb], axis=1).astype(jnp.float32)
    B, T, E = x.shape
    H = params["w_hh_t"].shape[0]

    def step(carry, x_t):
        h, c = carry
        gates = x_t @ params["w_ih_t"] + h @ params["w_hh_t"] + params["b"]
        i = jax.nn.sigmoid(gates[:, 0 * H:1 * H])
        f = jax.nn.sigmoid(gates[:, 1 * H:2 * H])
        g = jnp.tanh(gates[:, 2 * H:3 * H])
        o = jax.nn.sigmoid(gates[:, 3 * H:4 * H])
        c = f * c + i * g
        h = o * jnp.tanh(c)
        return (h, c), h

    h0 = jnp.zeros((B, H), jnp.float32)
    c0 = jnp.zeros((B, H), jnp.float32)
    _, hs = jax.lax.scan(step, (h0, c0), jnp.transpose(x, (1, 0, 2)))
    hs = jnp.transpose(hs, (1, 0, 2))                      # (B, T, H)
    return hs @ params["w_out_t"] + params["b_out"]        # (B, T, V)


# -----------------------------------------------------------------------------
# Deterministic parameter init (PyTorch-style uniform(-1/sqrt(H), 1/sqrt(H)))
# -----------------------------------------------------------------------------
def init_params(key, embed_size, hidden_size, vocab_size):
    ks = jax.random.split(key, 7)
    bound = 1.0 / jnp.sqrt(hidden_size)
    E, H, V = embed_size, hidden_size, vocab_size
    uni = lambda k, shape: jax.random.uniform(k, shape, jnp.float32, -bound, bound)
    return {
        "embedding": jax.random.normal(ks[0], (V, E), jnp.float32),
        # stored pre-transposed: (E, 4H), (H, 4H); gate order [i, f, g, o]
        "w_ih_t": uni(ks[1], (E, 4 * H)),
        "w_hh_t": uni(ks[2], (H, 4 * H)),
        "b": (uni(ks[3], (1, 4 * H)) + uni(ks[4], (1, 4 * H))),  # b_ih + b_hh
        "w_out_t": uni(ks[5], (H, V)),
        "b_out": uni(ks[6], (1, V)),
    }


if __name__ == "__main__":
    # Small but hardware-aligned shapes (multiples of 8 / 128 for lane-dense
    # stores and unpadded MXU tiles), consistent with the module's forward():
    #   features: (B, embed_size), captions: (B, seq) int ids
    B, T_cap, E, H, V = 8, 8, 128, 128, 256

    key = jax.random.PRNGKey(0)
    k_feat, k_cap, k_par = jax.random.split(key, 3)

    features = jax.random.normal(k_feat, (B, E), jnp.float32)
    captions = jax.random.randint(k_cap, (B, T_cap), 0, V, jnp.int32)
    params = init_params(k_par, E, H, V)

    out = decoder_rnn_forward(features, captions, params)
    out = jax.block_until_ready(out)
    assert out.shape == (B, T_cap, V), out.shape

    ref = decoder_rnn_reference(features, captions, params)
    ref = jax.block_until_ready(ref)
    assert jnp.allclose(out, ref, atol=2e-2, rtol=2e-2), (
        float(jnp.max(jnp.abs(out - ref))))

    print("KERNEL_OK")
</pallas_src>

<mosaic_0001>
module attributes {stable_mosaic.version = 11 : i64} {
  func.func @_matmul_bias_kernel(%arg0: i32, %arg1: i32, %arg2: memref<64x128xf32, #tpu.memory_space<vmem>>, %arg3: memref<128x256xf32, #tpu.memory_space<vmem>>, %arg4: memref<1x256xf32, #tpu.memory_space<vmem>>, %arg5: memref<64x256xf32, #tpu.memory_space<vmem>>) attributes {dimension_semantics = [#tpu.dimension_semantics<parallel>, #tpu.dimension_semantics<parallel>], iteration_bounds = array<i64: 1, 1>, scalar_prefetch = 0 : i64, scratch_operands = 0 : i64, tpu.core_type = #tpu.core_type<tc>, window_params = [{transform_indices = @transform_0, window_bounds = array<i64: 64, 128>}, {transform_indices = @transform_1, window_bounds = array<i64: 128, 256>}, {transform_indices = @transform_2, window_bounds = array<i64: 1, 256>}, {transform_indices = @transform_3, window_bounds = array<i64: 64, 256>}]} {
    %c0 = arith.constant 0 : index
    %c0_0 = arith.constant 0 : index
    %0 = vector.load %arg2[%c0, %c0_0] : memref<64x128xf32, #tpu.memory_space<vmem>>, vector<64x128xf32>
    %c0_1 = arith.constant 0 : index
    %c0_2 = arith.constant 0 : index
    %1 = vector.load %arg3[%c0_1, %c0_2] : memref<128x256xf32, #tpu.memory_space<vmem>>, vector<128x256xf32>
    %cst = arith.constant dense<0.000000e+00> : vector<64x256xf32>
    %2 = tpu.matmul %0, %1, %cst {dimension_numbers = #tpu.dot_dimension_numbers<[1], [0], [0], [1], [0, 0, 1, 1], [], []>} : vector<64x128xf32>, vector<128x256xf32>, vector<64x256xf32> -> vector<64x256xf32>
    %c0_3 = arith.constant 0 : index
    %c0_4 = arith.constant 0 : index
    %3 = vector.load %arg4[%c0_3, %c0_4] : memref<1x256xf32, #tpu.memory_space<vmem>>, vector<1x256xf32>
    %4 = vector.broadcast %3 : vector<1x256xf32> to vector<64x256xf32>
    %5 = arith.addf %2, %4 : vector<64x256xf32>
    %c0_5 = arith.constant 0 : index
    %c0_6 = arith.constant 0 : index
    %6 = vector.load %arg5[%c0_5, %c0_6] : memref<64x256xf32, #tpu.memory_space<vmem>>, vector<64x256xf32>
    tpu.vector_store %arg5[%c0_5, %c0_6], %5 {strides = array<i32>} : memref<64x256xf32, #tpu.memory_space<vmem>>, vector<64x256xf32>,
    return
  }
  func.func @transform_0(%arg0: i32, %arg1: i32) -> (i32, i32) {
    %c0_i32 = arith.constant 0 : i32
    %c0_i32_0 = arith.constant 0 : i32
    return %arg0, %c0_i32 : i32, i32
  }
  func.func @transform_1(%arg0: i32, %arg1: i32) -> (i32, i32) {
    %c0_i32 = arith.constant 0 : i32
    %c0_i32_0 = arith.constant 0 : i32
    return %c0_i32, %arg1 : i32, i32
  }
  func.func @transform_2(%arg0: i32, %arg1: i32) -> (i32, i32) {
    %c0_i32 = arith.constant 0 : i32
    %c0_i32_0 = arith.constant 0 : i32
    return %c0_i32, %arg1 : i32, i32
  }
  func.func @transform_3(%arg0: i32, %arg1: i32) -> (i32, i32) {
    %c0_i32 = arith.constant 0 : i32
    return %arg0, %arg1 : i32, i32
  }
}

module attributes {stable_mosaic.version = 11 : i64} {
  func.func @_matmul_bias_kernel(%arg0: i32, %arg1: i32, %arg2: memref<64x128xf32, #tpu.memory_space<vmem>>, %arg3: memref<128x512xf32, #tpu.memory_space<vmem>>, %arg4: memref<1x512xf32, #tpu.memory_space<vmem>>, %arg5: memref<64x512xf32, #tpu.memory_space<vmem>>) attributes {dimension_semantics = [#tpu.dimension_semantics<parallel>, #tpu.dimension_semantics<parallel>], iteration_bounds = array<i64: 1, 1>, scalar_prefetch = 0 : i64, scratch_operands = 0 : i64, tpu.core_type = #tpu.core_type<tc>, window_params = [{transform_indices = @transform_0, window_bounds = array<i64: 64, 128>}, {transform_indices = @transform_1, window_bounds = array<i64: 128, 512>}, {transform_indices = @transform_2, window_bounds = array<i64: 1, 512>}, {transform_indices = @transform_3, window_bounds = array<i64: 64, 512>}]} {
    %c0 = arith.constant 0 : index
    %c0_0 = arith.constant 0 : index
    %0 = vector.load %arg2[%c0, %c0_0] : memref<64x128xf32, #tpu.memory_space<vmem>>, vector<64x128xf32>
    %c0_1 = arith.constant 0 : index
    %c0_2 = arith.constant 0 : index
    %1 = vector.load %arg3[%c0_1, %c0_2] : memref<128x512xf32, #tpu.memory_space<vmem>>, vector<128x512xf32>
    %cst = arith.constant dense<0.000000e+00> : vector<64x512xf32>
    %2 = tpu.matmul %0, %1, %cst {dimension_numbers = #tpu.dot_dimension_numbers<[1], [0], [0], [1], [0, 0, 1, 1], [], []>} : vector<64x128xf32>, vector<128x512xf32>, vector<64x512xf32> -> vector<64x512xf32>
    %c0_3 = arith.constant 0 : index
    %c0_4 = arith.constant 0 : index
    %3 = vector.load %arg4[%c0_3, %c0_4] : memref<1x512xf32, #tpu.memory_space<vmem>>, vector<1x512xf32>
    %4 = vector.broadcast %3 : vector<1x512xf32> to vector<64x512xf32>
    %5 = arith.addf %2, %4 : vector<64x512xf32>
    %c0_5 = arith.constant 0 : index
    %c0_6 = arith.constant 0 : index
    %6 = vector.load %arg5[%c0_5, %c0_6] : memref<64x512xf32, #tpu.memory_space<vmem>>, vector<64x512xf32>
    tpu.vector_store %arg5[%c0_5, %c0_6], %5 {strides = array<i32>} : memref<64x512xf32, #tpu.memory_space<vmem>>, vector<64x512xf32>,
    return
  }
  func.func @transform_0(%arg0: i32, %arg1: i32) -> (i32, i32) {
    %c0_i32 = arith.constant 0 : i32
    %c0_i32_0 = arith.constant 0 : i32
    return %arg0, %c0_i32 : i32, i32
  }
  func.func @transform_1(%arg0: i32, %arg1: i32) -> (i32, i32) {
    %c0_i32 = arith.constant 0 : i32
    %c0_i32_0 = arith.constant 0 : i32
    return %c0_i32, %arg1 : i32, i32
  }
  func.func @transform_2(%arg0: i32, %arg1: i32) -> (i32, i32) {
    %c0_i32 = arith.constant 0 : i32
    %c0_i32_0 = arith.constant 0 : i32
    return %c0_i32, %arg1 : i32, i32
  }
  func.func @transform_3(%arg0: i32, %arg1: i32) -> (i32, i32) {
    %c0_i32 = arith.constant 0 : i32
    return %arg0, %arg1 : i32, i32
  }
}

module attributes {stable_mosaic.version = 11 : i64} {
  func.func @_lstm_recurrent_kernel(%arg0: i32, %arg1: memref<8x8x512xf32, #tpu.memory_space<vmem>>, %arg2: memref<128x512xf32, #tpu.memory_space<vmem>>, %arg3: memref<8x8x128xf32, #tpu.memory_space<vmem>>, %arg4: memref<8x128xf32, #tpu.memory_space<vmem>>, %arg5: memref<8x128xf32, #tpu.memory_space<vmem>>) attributes {dimension_semantics = [#tpu.dimension_semantics<arbitrary>], iteration_bounds = array<i64: 1>, scalar_prefetch = 0 : i64, scratch_operands = 2 : i64, tpu.core_type = #tpu.core_type<tc>, window_params = [{transform_indices = @transform_0, window_bounds = array<i64: 8, 8, 512>}, {pipeline_mode = #tpu.pipeline_mode<synchronous>, transform_indices = @transform_1, window_bounds = array<i64: 128, 512>}, {transform_indices = @transform_2, window_bounds = array<i64: 8, 8, 128>}]} {
    %c0_i32 = arith.constant 0 : i32
    %0 = arith.cmpi eq, %arg0, %c0_i32 : i32
    %1 = arith.extui %0 : i1 to i32
    %c0_i32_0 = arith.constant 0 : i32
    %2 = arith.cmpi ne, %1, %c0_i32_0 : i32
    scf.if %2 {
      %cst_74 = arith.constant 0.000000e+00 : f32
      %280 = vector.broadcast %cst_74 : f32 to vector<8x128xf32>
      %c0_75 = arith.constant 0 : index
      %c0_76 = arith.constant 0 : index
      %281 = vector.load %arg4[%c0_75, %c0_76] : memref<8x128xf32, #tpu.memory_space<vmem>>, vector<8x128xf32>
      tpu.vector_store %arg4[%c0_75, %c0_76], %280 {strides = array<i32>} : memref<8x128xf32, #tpu.memory_space<vmem>>, vector<8x128xf32>,
      %cst_77 = arith.constant 0.000000e+00 : f32
      %282 = vector.broadcast %cst_77 : f32 to vector<8x128xf32>
      %c0_78 = arith.constant 0 : index
      %c0_79 = arith.constant 0 : index
      %283 = vector.load %arg5[%c0_78, %c0_79] : memref<8x128xf32, #tpu.memory_space<vmem>>, vector<8x128xf32>
      tpu.vector_store %arg5[%c0_78, %c0_79], %282 {strides = array<i32>} : memref<8x128xf32, #tpu.memory_space<vmem>>, vector<8x128xf32>,
    } else {
    }
    %c0 = arith.constant 0 : index
    %c0_1 = arith.constant 0 : index
    %3 = vector.load %arg2[%c0, %c0_1] : memref<128x512xf32, #tpu.memory_space<vmem>>, vector<128x512xf32>
    %c0_2 = arith.constant 0 : index
    %c0_3 = arith.constant 0 : index
    %4 = vector.load %arg4[%c0_2, %c0_3] : memref<8x128xf32, #tpu.memory_space<vmem>>, vector<8x128xf32>
    %c0_4 = arith.constant 0 : index
    %c0_5 = arith.constant 0 : index
    %5 = vector.load %arg5[%c0_4, %c0_5] : memref<8x128xf32, #tpu.memory_space<vmem>>, vector<8x128xf32>
    %c0_i32_6 = arith.constant 0 : i32
    %6 = arith.index_cast %c0_i32_6 : i32 to index
    %c0_7 = arith.constant 0 : index
    %c0_8 = arith.constant 0 : index
    %7 = vector.load %arg1[%6, %c0_7, %c0_8] : memref<8x8x512xf32, #tpu.memory_space<vmem>>, vector<1x8x512xf32>
    %8 = vector.shape_cast %7 : vector<1x8x512xf32> to vector<8x512xf32>
    %cst = arith.constant dense<0.000000e+00> : vector<8x512xf32>
    %9 = tpu.matmul %4, %3, %cst {dimension_numbers = #tpu.dot_dimension_numbers<[1], [0], [0], [1], [0, 0, 1, 1], [], []>} : vector<8x128xf32>, vector<128x512xf32>, vector<8x512xf32> -> vector<8x512xf32>
    %10 = arith.addf %8, %9 : vector<8x512xf32>
    %11 = vector.extract_strided_slice %10 {offsets = [0, 0], sizes = [8, 128], strides = [1, 1]} : vector<8x512xf32> to vector<8x128xf32>
    %12 = arith.negf %11 : vector<8x128xf32>
    %13 = math.exp %12 : vector<8x128xf32>
    %cst_9 = arith.constant 1.000000e+00 : f32
    %14 = vector.broadcast %cst_9 : f32 to vector<8x128xf32>
    %15 = arith.addf %14, %13 : vector<8x128xf32>
    %16 = arith.divf %14, %15 : vector<8x128xf32>
    %17 = vector.extract_strided_slice %10 {offsets = [0, 128], sizes = [8, 128], strides = [1, 1]} : vector<8x512xf32> to vector<8x128xf32>
    %18 = arith.negf %17 : vector<8x128xf32>
    %19 = math.exp %18 : vector<8x128xf32>
    %cst_10 = arith.constant 1.000000e+00 : f32
    %20 = vector.broadcast %cst_10 : f32 to vector<8x128xf32>
    %21 = arith.addf %20, %19 : vector<8x128xf32>
    %22 = arith.divf %20, %21 : vector<8x128xf32>
    %23 = vector.extract_strided_slice %10 {offsets = [0, 256], sizes = [8, 128], strides = [1, 1]} : vector<8x512xf32> to vector<8x128xf32>
    %24 = math.tanh %23 : vector<8x128xf32>
    %25 = vector.extract_strided_slice %10 {offsets = [0, 384], sizes = [8, 128], strides = [1, 1]} : vector<8x512xf32> to vector<8x128xf32>
    %26 = arith.negf %25 : vector<8x128xf32>
    %27 = math.exp %26 : vector<8x128xf32>
    %cst_11 = arith.constant 1.000000e+00 : f32
    %28 = vector.broadcast %cst_11 : f32 to vector<8x128xf32>
    %29 = arith.addf %28, %27 : vector<8x128xf32>
    %30 = arith.divf %28, %29 : vector<8x128xf32>
    %31 = arith.mulf %22, %5 : vector<8x128xf32>
    %32 = arith.mulf %16, %24 : vector<8x128xf32>
    %33 = arith.addf %31, %32 : vector<8x128xf32>
    %34 = math.tanh %33 : vector<8x128xf32>
    %35 = arith.mulf %30, %34 : vector<8x128xf32>
    %36 = arith.index_cast %c0_i32_6 : i32 to index
    %c0_12 = arith.constant 0 : index
    %c0_13 = arith.constant 0 : index
    %37 = vector.load %arg3[%36, %c0_12, %c0_13] : memref<8x8x128xf32, #tpu.memory_space<vmem>>, vector<1x8x128xf32>
    %38 = vector.shape_cast %37 : vector<1x8x128xf32> to vector<8x128xf32>
    %39 = vector.shape_cast %35 : vector<8x128xf32> to vector<1x8x128xf32>
    tpu.vector_store %arg3[%36, %c0_12, %c0_13], %39 {strides = array<i32>} : memref<8x8x128xf32, #tpu.memory_space<vmem>>, vector<1x8x128xf32>,
    %c1_i32 = arith.constant 1 : i32
    %40 = arith.index_cast %c1_i32 : i32 to index
    %c0_14 = arith.constant 0 : index
    %c0_15 = arith.constant 0 : index
    %41 = vector.load %arg1[%40, %c0_14, %c0_15] : memref<8x8x512xf32, #tpu.memory_space<vmem>>, vector<1x8x512xf32>
    %42 = vector.shape_cast %41 : vector<1x8x512xf32> to vector<8x512xf32>
    %cst_16 = arith.constant dense<0.000000e+00> : vector<8x512xf32>
    %43 = tpu.matmul %35, %3, %cst_16 {dimension_numbers = #tpu.dot_dimension_numbers<[1], [0], [0], [1], [0, 0, 1, 1], [], []>} : vector<8x128xf32>, vector<128x512xf32>, vector<8x512xf32> -> vector<8x512xf32>
    %44 = arith.addf %42, %43 : vector<8x512xf32>
    %45 = vector.extract_strided_slice %44 {offsets = [0, 0], sizes = [8, 128], strides = [1, 1]} : vector<8x512xf32> to vector<8x128xf32>
    %46 = arith.negf %45 : vector<8x128xf32>
    %47 = math.exp %46 : vector<8x128xf32>
    %cst_17 = arith.constant 1.000000e+00 : f32
    %48 = vector.broadcast %cst_17 : f32 to vector<8x128xf32>
    %49 = arith.addf %48, %47 : vector<8x128xf32>
    %50 = arith.divf %48, %49 : vector<8x128xf32>
    %51 = vector.extract_strided_slice %44 {offsets = [0, 128], sizes = [8, 128], strides = [1, 1]} : vector<8x512xf32> to vector<8x128xf32>
    %52 = arith.negf %51 : vector<8x128xf32>
    %53 = math.exp %52 : vector<8x128xf32>
    %cst_18 = arith.constant 1.000000e+00 : f32
    %54 = vector.broadcast %cst_18 : f32 to vector<8x128xf32>
    %55 = arith.addf %54, %53 : vector<8x128xf32>
    %56 = arith.divf %54, %55 : vector<8x128xf32>
    %57 = vector.extract_strided_slice %44 {offsets = [0, 256], sizes = [8, 128], strides = [1, 1]} : vector<8x512xf32> to vector<8x128xf32>
    %58 = math.tanh %57 : vector<8x128xf32>
    %59 = vector.extract_strided_slice %44 {offsets = [0, 384], sizes = [8, 128], strides = [1, 1]} : vector<8x512xf32> to vector<8x128xf32>
    %60 = arith.negf %59 : vector<8x128xf32>
    %61 = math.exp %60 : vector<8x128xf32>
    %cst_19 = arith.constant 1.000000e+00 : f32
    %62 = vector.broadcast %cst_19 : f32 to vector<8x128xf32>
    %63 = arith.addf %62, %61 : vector<8x128xf32>
    %64 = arith.divf %62, %63 : vector<8x128xf32>
    %65 = arith.mulf %56, %33 : vector<8x128xf32>
    %66 = arith.mulf %50, %58 : vector<8x128xf32>
    %67 = arith.addf %65, %66 : vector<8x128xf32>
    %68 = math.tanh %67 : vector<8x128xf32>
    %69 = arith.mulf %64, %68 : vector<8x128xf32>
    %70 = arith.index_cast %c1_i32 : i32 to index
    %c0_20 = arith.constant 0 : index
    %c0_21 = arith.constant 0 : index
    %71 = vector.load %arg3[%70, %c0_20, %c0_21] : memref<8x8x128xf32, #tpu.memory_space<vmem>>, vector<1x8x128xf32>
    %72 = vector.shape_cast %71 : vector<1x8x128xf32> to vector<8x128xf32>
    %73 = vector.shape_cast %69 : vector<8x128xf32> to vector<1x8x128xf32>
    tpu.vector_store %arg3[%70, %c0_20, %c0_21], %73 {strides = array<i32>} : memref<8x8x128xf32, #tpu.memory_space<vmem>>, vector<1x8x128xf32>,
    %c2_i32 = arith.constant 2 : i32
    %74 = arith.index_cast %c2_i32 : i32 to index
    %c0_22 = arith.constant 0 : index
    %c0_23 = arith.constant 0 : index
    %75 = vector.load %arg1[%74, %c0_22, %c0_23] : memref<8x8x512xf32, #tpu.memory_space<vmem>>, vector<1x8x512xf32>
    %76 = vector.shape_cast %75 : vector<1x8x512xf32> to vector<8x512xf32>
    %cst_24 = arith.constant dense<0.000000e+00> : vector<8x512xf32>
    %77 = tpu.matmul %69, %3, %cst_24 {dimension_numbers = #tpu.dot_dimension_numbers<[1], [0], [0], [1], [0, 0, 1, 1], [], []>} : vector<8x128xf32>, vector<128x512xf32>, vector<8x512xf32> -> vector<8x512xf32>
    %78 = arith.addf %76, %77 : vector<8x512xf32>
    %79 = vector.extract_strided_slice %78 {offsets = [0, 0], sizes = [8, 128], strides = [1, 1]} : vector<8x512xf32> to vector<8x128xf32>
    %80 = arith.negf %79 : vector<8x128xf32>
    %81 = math.exp %80 : vector<8x128xf32>
    %cst_25 = arith.constant 1.000000e+00 : f32
    %82 = vector.broadcast %cst_25 : f32 to vector<8x128xf32>
    %83 = arith.addf %82, %81 : vector<8x128xf32>
    %84 = arith.divf %82, %83 : vector<8x128xf32>
    %85 = vector.extract_strided_slice %78 {offsets = [0, 128], sizes = [8, 128], strides = [1, 1]} : vector<8x512xf32> to vector<8x128xf32>
    %86 = arith.negf %85 : vector<8x128xf32>
    %87 = math.exp %86 : vector<8x128xf32>
    %cst_26 = arith.constant 1.000000e+00 : f32
    %88 = vector.broadcast %cst_26 : f32 to vector<8x128xf32>
    %89 = arith.addf %88, %87 : vector<8x128xf32>
    %90 = arith.divf %88, %89 : vector<8x128xf32>
    %91 = vector.extract_strided_slice %78 {offsets = [0, 256], sizes = [8, 128], strides = [1, 1]} : vector<8x512xf32> to vector<8x128xf32>
    %92 = math.tanh %91 : vector<8x128xf32>
    %93 = vector.extract_strided_slice %78 {offsets = [0, 384], sizes = [8, 128], strides = [1, 1]} : vector<8x512xf32> to vector<8x128xf32>
    %94 = arith.negf %93 : vector<8x128xf32>
    %95 = math.exp %94 : vector<8x128xf32>
    %cst_27 = arith.constant 1.000000e+00 : f32
    %96 = vector.broadcast %cst_27 : f32 to vector<8x128xf32>
    %97 = arith.addf %96, %95 : vector<8x128xf32>
    %98 = arith.divf %96, %97 : vector<8x128xf32>
    %99 = arith.mulf %90, %67 : vector<8x128xf32>
    %100 = arith.mulf %84, %92 : vector<8x128xf32>
    %101 = arith.addf %99, %100 : vector<8x128xf32>
    %102 = math.tanh %101 : vector<8x128xf32>
    %103 = arith.mulf %98, %102 : vector<8x128xf32>
    %104 = arith.index_cast %c2_i32 : i32 to index
    %c0_28 = arith.constant 0 : index
    %c0_29 = arith.constant 0 : index
    %105 = vector.load %arg3[%104, %c0_28, %c0_29] : memref<8x8x128xf32, #tpu.memory_space<vmem>>, vector<1x8x128xf32>
    %106 = vector.shape_cast %105 : vector<1x8x128xf32> to vector<8x128xf32>
    %107 = vector.shape_cast %103 : vector<8x128xf32> to vector<1x8x128xf32>
    tpu.vector_store %arg3[%104, %c0_28, %c0_29], %107 {strides = array<i32>} : memref<8x8x128xf32, #tpu.memory_space<vmem>>, vector<1x8x128xf32>,
    %c3_i32 = arith.constant 3 : i32
    %108 = arith.index_cast %c3_i32 : i32 to index
    %c0_30 = arith.constant 0 : index
    %c0_31 = arith.constant 0 : index
    %109 = vector.load %arg1[%108, %c0_30, %c0_31] : memref<8x8x512xf32, #tpu.memory_space<vmem>>, vector<1x8x512xf32>
    %110 = vector.shape_cast %109 : vector<1x8x512xf32> to vector<8x512xf32>
    %cst_32 = arith.constant dense<0.000000e+00> : vector<8x512xf32>
    %111 = tpu.matmul %103, %3, %cst_32 {dimension_numbers = #tpu.dot_dimension_numbers<[1], [0], [0], [1], [0, 0, 1, 1], [], []>} : vector<8x128xf32>, vector<128x512xf32>, vector<8x512xf32> -> vector<8x512xf32>
    %112 = arith.addf %110, %111 : vector<8x512xf32>
    %113 = vector.extract_strided_slice %112 {offsets = [0, 0], sizes = [8, 128], strides = [1, 1]} : vector<8x512xf32> to vector<8x128xf32>
    %114 = arith.negf %113 : vector<8x128xf32>
    %115 = math.exp %114 : vector<8x128xf32>
    %cst_33 = arith.constant 1.000000e+00 : f32
    %116 = vector.broadcast %cst_33 : f32 to vector<8x128xf32>
    %117 = arith.addf %116, %115 : vector<8x128xf32>
    %118 = arith.divf %116, %117 : vector<8x128xf32>
    %119 = vector.extract_strided_slice %112 {offsets = [0, 128], sizes = [8, 128], strides = [1, 1]} : vector<8x512xf32> to vector<8x128xf32>
    %120 = arith.negf %119 : vector<8x128xf32>
    %121 = math.exp %120 : vector<8x128xf32>
    %cst_34 = arith.constant 1.000000e+00 : f32
    %122 = vector.broadcast %cst_34 : f32 to vector<8x128xf32>
    %123 = arith.addf %122, %121 : vector<8x128xf32>
    %124 = arith.divf %122, %123 : vector<8x128xf32>
    %125 = vector.extract_strided_slice %112 {offsets = [0, 256], sizes = [8, 128], strides = [1, 1]} : vector<8x512xf32> to vector<8x128xf32>
    %126 = math.tanh %125 : vector<8x128xf32>
    %127 = vector.extract_strided_slice %112 {offsets = [0, 384], sizes = [8, 128], strides = [1, 1]} : vector<8x512xf32> to vector<8x128xf32>
    %128 = arith.negf %127 : vector<8x128xf32>
    %129 = math.exp %128 : vector<8x128xf32>
    %cst_35 = arith.constant 1.000000e+00 : f32
    %130 = vector.broadcast %cst_35 : f32 to vector<8x128xf32>
    %131 = arith.addf %130, %129 : vector<8x128xf32>
    %132 = arith.divf %130, %131 : vector<8x128xf32>
    %133 = arith.mulf %124, %101 : vector<8x128xf32>
    %134 = arith.mulf %118, %126 : vector<8x128xf32>
    %135 = arith.addf %133, %134 : vector<8x128xf32>
    %136 = math.tanh %135 : vector<8x128xf32>
    %137 = arith.mulf %132, %136 : vector<8x128xf32>
    %138 = arith.index_cast %c3_i32 : i32 to index
    %c0_36 = arith.constant 0 : index
    %c0_37 = arith.constant 0 : index
    %139 = vector.load %arg3[%138, %c0_36, %c0_37] : memref<8x8x128xf32, #tpu.memory_space<vmem>>, vector<1x8x128xf32>
    %140 = vector.shape_cast %139 : vector<1x8x128xf32> to vector<8x128xf32>
    %141 = vector.shape_cast %137 : vector<8x128xf32> to vector<1x8x128xf32>
    tpu.vector_store %arg3[%138, %c0_36, %c0_37], %141 {strides = array<i32>} : memref<8x8x128xf32, #tpu.memory_space<vmem>>, vector<1x8x128xf32>,
    %c4_i32 = arith.constant 4 : i32
    %142 = arith.index_cast %c4_i32 : i32 to index
    %c0_38 = arith.constant 0 : index
    %c0_39 = arith.constant 0 : index
    %143 = vector.load %arg1[%142, %c0_38, %c0_39] : memref<8x8x512xf32, #tpu.memory_space<vmem>>, vector<1x8x512xf32>
    %144 = vector.shape_cast %143 : vector<1x8x512xf32> to vector<8x512xf32>
    %cst_40 = arith.constant dense<0.000000e+00> : vector<8x512xf32>
    %145 = tpu.matmul %137, %3, %cst_40 {dimension_numbers = #tpu.dot_dimension_numbers<[1], [0], [0], [1], [0, 0, 1, 1], [], []>} : vector<8x128xf32>, vector<128x512xf32>, vector<8x512xf32> -> vector<8x512xf32>
    %146 = arith.addf %144, %145 : vector<8x512xf32>
    %147 = vector.extract_strided_slice %146 {offsets = [0, 0], sizes = [8, 128], strides = [1, 1]} : vector<8x512xf32> to vector<8x128xf32>
    %148 = arith.negf %147 : vector<8x128xf32>
    %149 = math.exp %148 : vector<8x128xf32>
    %cst_41 = arith.constant 1.000000e+00 : f32
    %150 = vector.broadcast %cst_41 : f32 to vector<8x128xf32>
    %151 = arith.addf %150, %149 : vector<8x128xf32>
    %152 = arith.divf %150, %151 : vector<8x128xf32>
    %153 = vector.extract_strided_slice %146 {offsets = [0, 128], sizes = [8, 128], strides = [1, 1]} : vector<8x512xf32> to vector<8x128xf32>
    %154 = arith.negf %153 : vector<8x128xf32>
    %155 = math.exp %154 : vector<8x128xf32>
    %cst_42 = arith.constant 1.000000e+00 : f32
    %156 = vector.broadcast %cst_42 : f32 to vector<8x128xf32>
    %157 = arith.addf %156, %155 : vector<8x128xf32>
    %158 = arith.divf %156, %157 : vector<8x128xf32>
    %159 = vector.extract_strided_slice %146 {offsets = [0, 256], sizes = [8, 128], strides = [1, 1]} : vector<8x512xf32> to vector<8x128xf32>
    %160 = math.tanh %159 : vector<8x128xf32>
    %161 = vector.extract_strided_slice %146 {offsets = [0, 384], sizes = [8, 128], strides = [1, 1]} : vector<8x512xf32> to vector<8x128xf32>
    %162 = arith.negf %161 : vector<8x128xf32>
    %163 = math.exp %162 : vector<8x128xf32>
    %cst_43 = arith.constant 1.000000e+00 : f32
    %164 = vector.broadcast %cst_43 : f32 to vector<8x128xf32>
    %165 = arith.addf %164, %163 : vector<8x128xf32>
    %166 = arith.divf %164, %165 : vector<8x128xf32>
    %167 = arith.mulf %158, %135 : vector<8x128xf32>
    %168 = arith.mulf %152, %160 : vector<8x128xf32>
    %169 = arith.addf %167, %168 : vector<8x128xf32>
    %170 = math.tanh %169 : vector<8x128xf32>
    %171 = arith.mulf %166, %170 : vector<8x128xf32>
    %172 = arith.index_cast %c4_i32 : i32 to index
    %c0_44 = arith.constant 0 : index
    %c0_45 = arith.constant 0 : index
    %173 = vector.load %arg3[%172, %c0_44, %c0_45] : memref<8x8x128xf32, #tpu.memory_space<vmem>>, vector<1x8x128xf32>
    %174 = vector.shape_cast %173 : vector<1x8x128xf32> to vector<8x128xf32>
    %175 = vector.shape_cast %171 : vector<8x128xf32> to vector<1x8x128xf32>
    tpu.vector_store %arg3[%172, %c0_44, %c0_45], %175 {strides = array<i32>} : memref<8x8x128xf32, #tpu.memory_space<vmem>>, vector<1x8x128xf32>,
    %c5_i32 = arith.constant 5 : i32
    %176 = arith.index_cast %c5_i32 : i32 to index
    %c0_46 = arith.constant 0 : index
    %c0_47 = arith.constant 0 : index
    %177 = vector.load %arg1[%176, %c0_46, %c0_47] : memref<8x8x512xf32, #tpu.memory_space<vmem>>, vector<1x8x512xf32>
    %178 = vector.shape_cast %177 : vector<1x8x512xf32> to vector<8x512xf32>
    %cst_48 = arith.constant dense<0.000000e+00> : vector<8x512xf32>
    %179 = tpu.matmul %171, %3, %cst_48 {dimension_numbers = #tpu.dot_dimension_numbers<[1], [0], [0], [1], [0, 0, 1, 1], [], []>} : vector<8x128xf32>, vector<128x512xf32>, vector<8x512xf32> -> vector<8x512xf32>
    %180 = arith.addf %178, %179 : vector<8x512xf32>
    %181 = vector.extract_strided_slice %180 {offsets = [0, 0], sizes = [8, 128], strides = [1, 1]} : vector<8x512xf32> to vector<8x128xf32>
    %182 = arith.negf %181 : vector<8x128xf32>
    %183 = math.exp %182 : vector<8x128xf32>
    %cst_49 = arith.constant 1.000000e+00 : f32
    %184 = vector.broadcast %cst_49 : f32 to vector<8x128xf32>
    %185 = arith.addf %184, %183 : vector<8x128xf32>
    %186 = arith.divf %184, %185 : vector<8x128xf32>
    %187 = vector.extract_strided_slice %180 {offsets = [0, 128], sizes = [8, 128], strides = [1, 1]} : vector<8x512xf32> to vector<8x128xf32>
    %188 = arith.negf %187 : vector<8x128xf32>
    %189 = math.exp %188 : vector<8x128xf32>
    %cst_50 = arith.constant 1.000000e+00 : f32
    %190 = vector.broadcast %cst_50 : f32 to vector<8x128xf32>
    %191 = arith.addf %190, %189 : vector<8x128xf32>
    %192 = arith.divf %190, %191 : vector<8x128xf32>
    %193 = vector.extract_strided_slice %180 {offsets = [0, 256], sizes = [8, 128], strides = [1, 1]} : vector<8x512xf32> to vector<8x128xf32>
    %194 = math.tanh %193 : vector<8x128xf32>
    %195 = vector.extract_strided_slice %180 {offsets = [0, 384], sizes = [8, 128], strides = [1, 1]} : vector<8x512xf32> to vector<8x128xf32>
    %196 = arith.negf %195 : vector<8x128xf32>
    %197 = math.exp %196 : vector<8x128xf32>
    %cst_51 = arith.constant 1.000000e+00 : f32
    %198 = vector.broadcast %cst_51 : f32 to vector<8x128xf32>
    %199 = arith.addf %198, %197 : vector<8x128xf32>
    %200 = arith.divf %198, %199 : vector<8x128xf32>
    %201 = arith.mulf %192, %169 : vector<8x128xf32>
    %202 = arith.mulf %186, %194 : vector<8x128xf32>
    %203 = arith.addf %201, %202 : vector<8x128xf32>
    %204 = math.tanh %203 : vector<8x128xf32>
    %205 = arith.mulf %200, %204 : vector<8x128xf32>
    %206 = arith.index_cast %c5_i32 : i32 to index
    %c0_52 = arith.constant 0 : index
    %c0_53 = arith.constant 0 : index
    %207 = vector.load %arg3[%206, %c0_52, %c0_53] : memref<8x8x128xf32, #tpu.memory_space<vmem>>, vector<1x8x128xf32>
    %208 = vector.shape_cast %207 : vector<1x8x128xf32> to vector<8x128xf32>
    %209 = vector.shape_cast %205 : vector<8x128xf32> to vector<1x8x128xf32>
    tpu.vector_store %arg3[%206, %c0_52, %c0_53], %209 {strides = array<i32>} : memref<8x8x128xf32, #tpu.memory_space<vmem>>, vector<1x8x128xf32>,
    %c6_i32 = arith.constant 6 : i32
    %210 = arith.index_cast %c6_i32 : i32 to index
    %c0_54 = arith.constant 0 : index
    %c0_55 = arith.constant 0 : index
    %211 = vector.load %arg1[%210, %c0_54, %c0_55] : memref<8x8x512xf32, #tpu.memory_space<vmem>>, vector<1x8x512xf32>
    %212 = vector.shape_cast %211 : vector<1x8x512xf32> to vector<8x512xf32>
    %cst_56 = arith.constant dense<0.000000e+00> : vector<8x512xf32>
    %213 = tpu.matmul %205, %3, %cst_56 {dimension_numbers = #tpu.dot_dimension_numbers<[1], [0], [0], [1], [0, 0, 1, 1], [], []>} : vector<8x128xf32>, vector<128x512xf32>, vector<8x512xf32> -> vector<8x512xf32>
    %214 = arith.addf %212, %213 : vector<8x512xf32>
    %215 = vector.extract_strided_slice %214 {offsets = [0, 0], sizes = [8, 128], strides = [1, 1]} : vector<8x512xf32> to vector<8x128xf32>
    %216 = arith.negf %215 : vector<8x128xf32>
    %217 = math.exp %216 : vector<8x128xf32>
    %cst_57 = arith.constant 1.000000e+00 : f32
    %218 = vector.broadcast %cst_57 : f32 to vector<8x128xf32>
    %219 = arith.addf %218, %217 : vector<8x128xf32>
    %220 = arith.divf %218, %219 : vector<8x128xf32>
    %221 = vector.extract_strided_slice %214 {offsets = [0, 128], sizes = [8, 128], strides = [1, 1]} : vector<8x512xf32> to vector<8x128xf32>
    %222 = arith.negf %221 : vector<8x128xf32>
    %223 = math.exp %222 : vector<8x128xf32>
    %cst_58 = arith.constant 1.000000e+00 : f32
    %224 = vector.broadcast %cst_58 : f32 to vector<8x128xf32>
    %225 = arith.addf %224, %223 : vector<8x128xf32>
    %226 = arith.divf %224, %225 : vector<8x128xf32>
    %227 = vector.extract_strided_slice %214 {offsets = [0, 256], sizes = [8, 128], strides = [1, 1]} : vector<8x512xf32> to vector<8x128xf32>
    %228 = math.tanh %227 : vector<8x128xf32>
    %229 = vector.extract_strided_slice %214 {offsets = [0, 384], sizes = [8, 128], strides = [1, 1]} : vector<8x512xf32> to vector<8x128xf32>
    %230 = arith.negf %229 : vector<8x128xf32>
    %231 = math.exp %230 : vector<8x128xf32>
    %cst_59 = arith.constant 1.000000e+00 : f32
    %232 = vector.broadcast %cst_59 : f32 to vector<8x128xf32>
    %233 = arith.addf %232, %231 : vector<8x128xf32>
    %234 = arith.divf %232, %233 : vector<8x128xf32>
    %235 = arith.mulf %226, %203 : vector<8x128xf32>
    %236 = arith.mulf %220, %228 : vector<8x128xf32>
    %237 = arith.addf %235, %236 : vector<8x128xf32>
    %238 = math.tanh %237 : vector<8x128xf32>
    %239 = arith.mulf %234, %238 : vector<8x128xf32>
    %240 = arith.index_cast %c6_i32 : i32 to index
    %c0_60 = arith.constant 0 : index
    %c0_61 = arith.constant 0 : index
    %241 = vector.load %arg3[%240, %c0_60, %c0_61] : memref<8x8x128xf32, #tpu.memory_space<vmem>>, vector<1x8x128xf32>
    %242 = vector.shape_cast %241 : vector<1x8x128xf32> to vector<8x128xf32>
    %243 = vector.shape_cast %239 : vector<8x128xf32> to vector<1x8x128xf32>
    tpu.vector_store %arg3[%240, %c0_60, %c0_61], %243 {strides = array<i32>} : memref<8x8x128xf32, #tpu.memory_space<vmem>>, vector<1x8x128xf32>,
    %c7_i32 = arith.constant 7 : i32
    %244 = arith.index_cast %c7_i32 : i32 to index
    %c0_62 = arith.constant 0 : index
    %c0_63 = arith.constant 0 : index
    %245 = vector.load %arg1[%244, %c0_62, %c0_63] : memref<8x8x512xf32, #tpu.memory_space<vmem>>, vector<1x8x512xf32>
    %246 = vector.shape_cast %245 : vector<1x8x512xf32> to vector<8x512xf32>
    %cst_64 = arith.constant dense<0.000000e+00> : vector<8x512xf32>
    %247 = tpu.matmul %239, %3, %cst_64 {dimension_numbers = #tpu.dot_dimension_numbers<[1], [0], [0], [1], [0, 0, 1, 1], [], []>} : vector<8x128xf32>, vector<128x512xf32>, vector<8x512xf32> -> vector<8x512xf32>
    %248 = arith.addf %246, %247 : vector<8x512xf32>
    %249 = vector.extract_strided_slice %248 {offsets = [0, 0], sizes = [8, 128], strides = [1, 1]} : vector<8x512xf32> to vector<8x128xf32>
    %250 = arith.negf %249 : vector<8x128xf32>
    %251 = math.exp %250 : vector<8x128xf32>
    %cst_65 = arith.constant 1.000000e+00 : f32
    %252 = vector.broadcast %cst_65 : f32 to vector<8x128xf32>
    %253 = arith.addf %252, %251 : vector<8x128xf32>
    %254 = arith.divf %252, %253 : vector<8x128xf32>
    %255 = vector.extract_strided_slice %248 {offsets = [0, 128], sizes = [8, 128], strides = [1, 1]} : vector<8x512xf32> to vector<8x128xf32>
    %256 = arith.negf %255 : vector<8x128xf32>
    %257 = math.exp %256 : vector<8x128xf32>
    %cst_66 = arith.constant 1.000000e+00 : f32
    %258 = vector.broadcast %cst_66 : f32 to vector<8x128xf32>
    %259 = arith.addf %258, %257 : vector<8x128xf32>
    %260 = arith.divf %258, %259 : vector<8x128xf32>
    %261 = vector.extract_strided_slice %248 {offsets = [0, 256], sizes = [8, 128], strides = [1, 1]} : vector<8x512xf32> to vector<8x128xf32>
    %262 = math.tanh %261 : vector<8x128xf32>
    %263 = vector.extract_strided_slice %248 {offsets = [0, 384], sizes = [8, 128], strides = [1, 1]} : vector<8x512xf32> to vector<8x128xf32>
    %264 = arith.negf %263 : vector<8x128xf32>
    %265 = math.exp %264 : vector<8x128xf32>
    %cst_67 = arith.constant 1.000000e+00 : f32
    %266 = vector.broadcast %cst_67 : f32 to vector<8x128xf32>
    %267 = arith.addf %266, %265 : vector<8x128xf32>
    %268 = arith.divf %266, %267 : vector<8x128xf32>
    %269 = arith.mulf %260, %237 : vector<8x128xf32>
    %270 = arith.mulf %254, %262 : vector<8x128xf32>
    %271 = arith.addf %269, %270 : vector<8x128xf32>
    %272 = math.tanh %271 : vector<8x128xf32>
    %273 = arith.mulf %268, %272 : vector<8x128xf32>
    %274 = arith.index_cast %c7_i32 : i32 to index
    %c0_68 = arith.constant 0 : index
    %c0_69 = arith.constant 0 : index
    %275 = vector.load %arg3[%274, %c0_68, %c0_69] : memref<8x8x128xf32, #tpu.memory_space<vmem>>, vector<1x8x128xf32>
    %276 = vector.shape_cast %275 : vector<1x8x128xf32> to vector<8x128xf32>
    %277 = vector.shape_cast %273 : vector<8x128xf32> to vector<1x8x128xf32>
    tpu.vector_store %arg3[%274, %c0_68, %c0_69], %277 {strides = array<i32>} : memref<8x8x128xf32, #tpu.memory_space<vmem>>, vector<1x8x128xf32>,
    %c8_i32 = arith.constant 8 : i32
    %c0_70 = arith.constant 0 : index
    %c0_71 = arith.constant 0 : index
    %278 = vector.load %arg4[%c0_70, %c0_71] : memref<8x128xf32, #tpu.memory_space<vmem>>, vector<8x128xf32>
    tpu.vector_store %arg4[%c0_70, %c0_71], %273 {strides = array<i32>} : memref<8x128xf32, #tpu.memory_space<vmem>>, vector<8x128xf32>,
    %c0_72 = arith.constant 0 : index
    %c0_73 = arith.constant 0 : index
    %279 = vector.load %arg5[%c0_72, %c0_73] : memref<8x128xf32, #tpu.memory_space<vmem>>, vector<8x128xf32>
    tpu.vector_store %arg5[%c0_72, %c0_73], %271 {strides = array<i32>} : memref<8x128xf32, #tpu.memory_space<vmem>>, vector<8x128xf32>,
    return
  }
  func.func @transform_0(%arg0: i32) -> (i32, i32, i32) {
    %c0_i32 = arith.constant 0 : i32
    %c0_i32_0 = arith.constant 0 : i32
    %c0_i32_1 = arith.constant 0 : i32
    return %arg0, %c0_i32, %c0_i32_0 : i32, i32, i32
  }
  func.func @transform_1(%arg0: i32) -> (i32, i32) {
    %c0_i32 = arith.constant 0 : i32
    %c0_i32_0 = arith.constant 0 : i32
    %c0_i32_1 = arith.constant 0 : i32
    return %c0_i32, %c0_i32_0 : i32, i32
  }
  func.func @transform_2(%arg0: i32) -> (i32, i32, i32) {
    %c0_i32 = arith.constant 0 : i32
    %c0_i32_0 = arith.constant 0 : i32
    %c0_i32_1 = arith.constant 0 : i32
    return %arg0, %c0_i32, %c0_i32_0 : i32, i32, i32
  }
}

</mosaic_0001>

<bundles_post_ra>
// kernel: decoder_rnn_forward.5
= control target key start
LH: loop header
LB: loop body
LE: loop exit
PB: predicated region body
PF: predicated region fallthrough
CT: control target
= control target key end

     0   :  { %s420_s0 = inlined_call_operand.vmem [shape: f32[64,128], index: 0, kind: input, shape index: {}]   ;;  %s421_s1 = inlined_call_operand.vmem [shape: f32[128,256], index: 1, kind: input, shape index: {}]   ;;  %s422_s2 = inlined_call_operand.vmem [shape: f32[1,256], index: 2, kind: input, shape index: {}]   ;;  %s423_s3 = inlined_call_operand.hbm [shape: f32[64,256], index: 3, kind: output, shape index: {}]  }
   0x1   :  { %v54_v0 = vld [vmem:[%s421_s1 + $0xf8] sm:$0xff]  ;;  %v53_v1 = vld [vmem:[%s421_s1 + $0xf0] sm:$0xff]  ;;  %v52_v2 = vld [vmem:[%s421_s1 + $0xe8] sm:$0xff] }
   0x2   :  { %67 = vmatprep.subr.mxu0 %v54_v0  ;;  %212 = vmatprep.subr.mxu1 %v54_v0  ;;  %v51_v3 = vld [vmem:[%s421_s1 + $0xe0] sm:$0xff]  ;;  %v50_v4 = vld [vmem:[%s421_s1 + $0xd8] sm:$0xff]  ;;  %v49_v5 = vld [vmem:[%s421_s1 + $0xd0] sm:$0xff] }
   0x3   :  { %68 = vmatpush1.msra.mxu0 %v53_v1  ;;  %228 = vmatpush1.msra.mxu1 %v53_v1  ;;  %v48_v6 = vld [vmem:[%s421_s1 + $0xc8] sm:$0xff]  ;;  %v47_v7 = vld [vmem:[%s421_s1 + $0xc0] sm:$0xff]  ;;  %v46_v8 = vld [vmem:[%s421_s1 + $0xb8] sm:$0xff] }
   0x4   :  { %69 = vmatprep.subr.mxu0 %v52_v2  ;;  %213 = vmatprep.subr.mxu1 %v52_v2  ;;  %v45_v9 = vld [vmem:[%s421_s1 + $0xb0] sm:$0xff]  ;;  %v44_v10 = vld [vmem:[%s421_s1 + $0xa8] sm:$0xff]  ;;  %v43_v11 = vld [vmem:[%s421_s1 + $0xa0] sm:$0xff] }
   0x5   :  { %70 = vmatpush1.msra.mxu0 %v51_v3  ;;  %229 = vmatpush1.msra.mxu1 %v51_v3  ;;  %v42_v12 = vld [vmem:[%s421_s1 + $0x98] sm:$0xff]  ;;  %v41_v13 = vld [vmem:[%s421_s1 + $0x90] sm:$0xff]  ;;  %v40_v14 = vld [vmem:[%s421_s1 + $0x88] sm:$0xff] }
   0x6   :  { %71 = vmatprep.subr.mxu0 %v50_v4  ;;  %214 = vmatprep.subr.mxu1 %v50_v4  ;;  %v39_v15 = vld [vmem:[%s421_s1 + $0x80] sm:$0xff] }
   0x7   :  { %72 = vmatpush1.msra.mxu0 %v49_v5  ;;  %230 = vmatpush1.msra.mxu1 %v49_v5 }
   0x8   :  { %73 = vmatprep.subr.mxu0 %v48_v6  ;;  %215 = vmatprep.subr.mxu1 %v48_v6 }
   0x9   :  { %74 = vmatpush1.msra.mxu0 %v47_v7  ;;  %231 = vmatpush1.msra.mxu1 %v47_v7 }
   0xa   :  { %75 = vmatprep.subr.mxu0 %v46_v8  ;;  %216 = vmatprep.subr.mxu1 %v46_v8 }
   0xb   :  { %76 = vmatpush1.msra.mxu0 %v45_v9  ;;  %232 = vmatpush1.msra.mxu1 %v45_v9 }
   0xc   :  { %77 = vmatprep.subr.mxu0 %v44_v10  ;;  %217 = vmatprep.subr.mxu1 %v44_v10 }
   0xd   :  { %78 = vmatpush1.msra.mxu0 %v43_v11  ;;  %233 = vmatpush1.msra.mxu1 %v43_v11 }
   0xe   :  { %79 = vmatprep.subr.mxu0 %v42_v12  ;;  %218 = vmatprep.subr.mxu1 %v42_v12 }
   0xf   :  { %8 = vsyncpa [#allocation3], 0  ;;  %80 = vmatpush1.msra.mxu0 %v41_v13  ;;  %234 = vmatpush1.msra.mxu1 %v41_v13  ;;  %v38_v16 = vld [vmem:[%s421_s1 + $0x78] sm:$0xff]  ;;  %v37_v17 = vld [vmem:[%s421_s1 + $0x70] sm:$0xff]  ;;  %v270_v34 = vmov 0.0   ;;  %v57_v41 = vlaneseq }
  0x10   :  { %81 = vmatprep.subr.mxu0 %v40_v14  ;;  %219 = vmatprep.subr.mxu1 %v40_v14  ;;  %v36_v18 = vld [vmem:[%s421_s1 + $0x68] sm:$0xff]  ;;  %v35_v19 = vld [vmem:[%s421_s1 + $0x60] sm:$0xff]  ;;  %v34_v20 = vld [vmem:[%s421_s1 + $0x58] sm:$0xff] }
  0x11   :  { %82 = vmatpush1.msra.mxu0 %v39_v15  ;;  %235 = vmatpush1.msra.mxu1 %v39_v15  ;;  %v33_v21 = vld [vmem:[%s421_s1 + $0x50] sm:$0xff]  ;;  %v32_v22 = vld [vmem:[%s421_s1 + $0x48] sm:$0xff]  ;;  %v31_v23 = vld [vmem:[%s421_s1 + $0x40] sm:$0xff]  ;;  %v58_v42 = vshrl.u32 %v57_v41, 7 }
  0x12   :  { %83 = vmatprep.subr.mxu0 %v38_v16  ;;  %220 = vmatprep.subr.mxu1 %v38_v16  ;;  %v30_v24 = vld [vmem:[%s421_s1 + $0x38] sm:$0xff]  ;;  %v29_v25 = vld [vmem:[%s421_s1 + $0x30] sm:$0xff]  ;;  %v28_v26 = vld [vmem:[%s421_s1 + $0x28] sm:$0xff] }
  0x13   :  { %84 = vmatpush1.msra.mxu0 %v37_v17  ;;  %236 = vmatpush1.msra.mxu1 %v37_v17  ;;  %v27_v27 = vld [vmem:[%s421_s1 + $0x20] sm:$0xff]  ;;  %v26_v28 = vld [vmem:[%s421_s1 + $0x18] sm:$0xff]  ;;  %v25_v29 = vld [vmem:[%s421_s1 + $0x10] sm:$0xff]  ;;  %v59_v43 = vsub.s32 0, %v58_v42  ;;  %v63_v45 = vsub.s32 1, %v58_v42 }
  0x14   :  { %85 = vmatprep.subr.mxu0 %v36_v18  ;;  %221 = vmatprep.subr.mxu1 %v36_v18  ;;  %v24_v30 = vld [vmem:[%s421_s1 + $0x8] sm:$0xff]  ;;  %v23_v31 = vld [vmem:[%s421_s1] sm:$0xff]  ;;  %v17_v37 = vld [vmem:[%s420_s0 + $0x10] sm:$0xff] }
  0x15   :  { %86 = vmatpush1.msra.mxu0 %v35_v19  ;;  %237 = vmatpush1.msra.mxu1 %v35_v19  ;;  %v15_v32 = vld [vmem:[%s420_s0] sm:$0xff]  ;;  %v16_v35 = vld [vmem:[%s420_s0 + $0x8] sm:$0xff]  ;;  %v21_v38 = vld [vmem:[%s420_s0 + $0x30] sm:$0xff] }
  0x16   :  { %87 = vmatprep.subr.mxu0 %v34_v20  ;;  %222 = vmatprep.subr.mxu1 %v34_v20  ;;  %v19_v33 = vld [vmem:[%s420_s0 + $0x20] sm:$0xff]  ;;  %v20_v36 = vld [vmem:[%s420_s0 + $0x28] sm:$0xff]  ;;  %v18_v39 = vld [vmem:[%s420_s0 + $0x18] sm:$0xff] }
  0x17   :  { %88 = vmatpush1.msra.mxu0 %v33_v21  ;;  %238 = vmatpush1.msra.mxu1 %v33_v21  ;;  %v22_v40 = vld [vmem:[%s420_s0 + $0x38] sm:$0xff]  ;;  %v55_v44 = vld [vmem:[%s422_s2] sm:$0x3]  ;;  %s271_s0 = smov [#allocation2]  }
  0x18   :  { %89 = vmatprep.subr.mxu0 %v32_v22  ;;  %223 = vmatprep.subr.mxu1 %v32_v22  ;;  %v60_v46 = vrot.slane %v55_v44, %v59_v43  ;;  %v64_v47 = vrot.slane %v55_v44, %v63_v45  ;;  %s201_s2 = sshll.u32 %s271_s0, 4  ;;  %s202_s2 = int_to_ptr.vmem [resolvable:$true] %s201_s2 }
  0x19   :  { %90 = vmatpush1.msra.mxu0 %v31_v23  ;;  %239 = vmatpush1.msra.mxu1 %v31_v23  ;;  %s248_s12 = scalar_lea.vmem %s202_s2, 2048  ;;  %p253_p1 = scmp.lt.s32.totalorder %s202_s2, %s202_s2 }
  0x1a   :  { %91 = vmatprep.subr.mxu0 %v30_v24  ;;  %224 = vmatprep.subr.mxu1 %v30_v24  ;;  %p249_p0 = scmp.ne.s32.totalorder %s202_s2, %s248_s12  ;;  %p254_p2 = scmp.lt.s32.totalorder %s248_s12, %s248_s12 }
  0x1b   :  { %92 = vmatpush1.msra.mxu0 %v29_v25  ;;  %240 = vmatpush1.msra.mxu1 %v29_v25 }
  0x1c   :  { %93 = vmatprep.subr.mxu0 %v28_v26  ;;  %225 = vmatprep.subr.mxu1 %v28_v26  ;;  %p255_p3 = por %p254_p2, %p253_p1 }
  0x1d   :  { %94 = vmatpush1.msra.mxu0 %v27_v27  ;;  %241 = vmatpush1.msra.mxu1 %v27_v27 }
  0x1e   :  { %95 = vmatprep.subr.mxu0 %v26_v28  ;;  %226 = vmatprep.subr.mxu1 %v26_v28  ;;  %p256_p4 = pnand %p255_p3, %p249_p0 }
  0x1f   :  { %96 = vmatpush1.msra.mxu0 %v25_v29  ;;  %242 = vmatpush1.msra.mxu1 %v25_v29 }
  0x20   :  { %97 = vmatprep.subr.mxu0 %v24_v30  ;;  %227 = vmatprep.subr.mxu1 %v24_v30 }
  0x21   :  { %98 = vmatpush1.msra.mxu0 %v23_v31  ;;  %243 = vmatpush1.msra.mxu1 %v23_v31 }
  0x22   :  { %131 = vmatprep.mubr.f32.mxu0 %v270_v34  ;;  %155 = vmatprep.mubr.f32.mxu1 %v270_v34 }
  0x23   :  { %132 = vmatmul.mubr.f32.vlgmr.msra.gmra.mxu0 %v15_v32  ;;  %156 = vmatmul.mubr.f32.vlgmr.msra.gmra.mxu1 %v19_v33 }
  0x24   :  { %137 = vmatprep.mubr.f32.mxu0 %v270_v34  ;;  %161 = vmatprep.mubr.f32.mxu1 %v270_v34 }
  0x27   :  { %138 = vmatmul.mubr.f32.gmra.mxu0 %v16_v35  ;;  %162 = vmatmul.mubr.f32.gmra.mxu1 %v20_v36 }
  0x28   :  { %143 = vmatprep.mubr.f32.mxu0 %v270_v34  ;;  %167 = vmatprep.mubr.f32.mxu1 %v270_v34 }
  0x2b   :  { %144 = vmatmul.mubr.f32.gmra.mxu0 %v17_v37  ;;  %168 = vmatmul.mubr.f32.gmra.mxu1 %v21_v38 }
  0x2c   :  { %149 = vmatprep.mubr.f32.mxu0 %v270_v34  ;;  %173 = vmatprep.mubr.f32.mxu1 %v270_v34 }
  0x2f   :  { %150 = vmatmul.mubr.f32.gmra.mxu0 %v18_v39  ;;  %174 = vmatmul.mubr.f32.gmra.mxu1 %v22_v40 }
  0xe3   :  { %v133_v48 = vpop.f32.mrf.mxu0  ;;  %v157_v49 = vpop.f32.mrf.mxu1 }
  0xe4   :  { %v134_v50 = vadd.f32 %v133_v48, %v60_v46  ;;  %v158_v51 = vadd.f32 %v157_v49, %v60_v46 }
  0xe5   :  { %v135_v52 = vpop.f32.mrf.mxu0  ;;  %v159_v53 = vpop.f32.mrf.mxu1 }
  0xe6   :  { %180 = vst [vmem:[#allocation2] sm:$0xff] %v134_v50  ;;  %188 = vst [vmem:[#allocation2 + $0x40] sm:$0xff] %v158_v51  ;;  %v136_v54 = vadd.f32 %v135_v52, %v64_v47  ;;  %v160_v55 = vadd.f32 %v159_v53, %v64_v47 }
  0xe7   :  { %v139_v56 = vpop.f32.mrf.mxu0  ;;  %v163_v57 = vpop.f32.mrf.mxu1 }
  0xe8   :  { %181 = vst [vmem:[#allocation2 + $0x8] sm:$0xff] %v136_v54  ;;  %189 = vst [vmem:[#allocation2 + $0x48] sm:$0xff] %v160_v55  ;;  %v140_v58 = vadd.f32 %v139_v56, %v60_v46  ;;  %v164_v59 = vadd.f32 %v163_v57, %v60_v46 }
  0xe9   :  { %v141_v60 = vpop.f32.mrf.mxu0  ;;  %v165_v61 = vpop.f32.mrf.mxu1 }
  0xea   :  { %182 = vst [vmem:[#allocation2 + $0x10] sm:$0xff] %v140_v58  ;;  %190 = vst [vmem:[#allocation2 + $0x50] sm:$0xff] %v164_v59  ;;  %v142_v62 = vadd.f32 %v141_v60, %v64_v47  ;;  %v166_v63 = vadd.f32 %v165_v61, %v64_v47 }
  0xeb   :  { %v145_v0 = vpop.f32.mrf.mxu0  ;;  %v169_v1 = vpop.f32.mrf.mxu1 }
  0xec   :  { %183 = vst [vmem:[#allocation2 + $0x18] sm:$0xff] %v142_v62  ;;  %191 = vst [vmem:[#allocation2 + $0x58] sm:$0xff] %v166_v63  ;;  %v146_v2 = vadd.f32 %v145_v0, %v60_v46  ;;  %v170_v3 = vadd.f32 %v169_v1, %v60_v46 }
  0xed   :  { %v147_v4 = vpop.f32.mrf.mxu0  ;;  %v171_v5 = vpop.f32.mrf.mxu1 }
  0xee   :  { %184 = vst [vmem:[#allocation2 + $0x20] sm:$0xff] %v146_v2  ;;  %192 = vst [vmem:[#allocation2 + $0x60] sm:$0xff] %v170_v3  ;;  %v148_v6 = vadd.f32 %v147_v4, %v64_v47  ;;  %v172_v7 = vadd.f32 %v171_v5, %v64_v47 }
  0xef   :  { %v151_v8 = vpop.f32.mrf.mxu0  ;;  %v175_v9 = vpop.f32.mrf.mxu1 }
  0xf0   :  { %185 = vst [vmem:[#allocation2 + $0x28] sm:$0xff] %v148_v6  ;;  %193 = vst [vmem:[#allocation2 + $0x68] sm:$0xff] %v172_v7  ;;  %v152_v10 = vadd.f32 %v151_v8, %v60_v46  ;;  %v176_v11 = vadd.f32 %v175_v9, %v60_v46 }
  0xf1   :  { %v153_v12 = vpop.f32.mrf.mxu0  ;;  %v177_v13 = vpop.f32.mrf.mxu1 }
  0xf2   :  { %186 = vst [vmem:[#allocation2 + $0x30] sm:$0xff] %v152_v10  ;;  %194 = vst [vmem:[#allocation2 + $0x70] sm:$0xff] %v176_v11  ;;  %v154_v14 = vadd.f32 %v153_v12, %v64_v47  ;;  %v178_v15 = vadd.f32 %v177_v13, %v64_v47 }
  0xf4   :  { %187 = vst [vmem:[#allocation2 + $0x38] sm:$0xff] %v154_v14  ;;  %195 = vst [vmem:[#allocation2 + $0x78] sm:$0xff] %v178_v15 }
  0xf5   :  { %259 = shalt.err (!%p256_p4)
}
  0xf6   :  { %s272_s13 = smov 256   ;;  %s273_s14 = smov 16  }
  0xf7   :  { %207 = dma.vmem_to_hbm [thread:$0]  %s202_s2, 2048, %s423_s3, [#allocation3], %s272_s13, %s272_s13, %s273_s14  }
  0xf8   :  { %268 = dma.done.wait [#allocation3], 2048  }
  0xf9   :  { %269 = vsyncadd [#allocation3], 4294965248 }
  0xfa   :  { %211 = vsyncpa [#allocation3], 1 }

// kernel: decoder_rnn_forward.3
= control target key start
LH: loop header
LB: loop body
LE: loop exit
PB: predicated region body
PF: predicated region fallthrough
CT: control target
= control target key end

     0   :  { %v371_v3 = vmov 0.0   ;;  %s763_s1 = inlined_call_operand.vmem [shape: f32[128,512], index: 1, kind: input, shape index: {}]   ;;  %s764_s0 = inlined_call_operand.vmem [shape: f32[64,128], index: 0, kind: input, shape index: {}]   ;;  %s765_s2 = inlined_call_operand.vmem [shape: f32[1,512], index: 2, kind: input, shape index: {}]   ;;  %s766_s3 = inlined_call_operand.vmem [shape: f32[64,512], index: 3, kind: output, shape index: {}]  }
   0x1   :  { %v83_v0 = vld [vmem:[%s763_s1 + $0x1e8] sm:$0xff]  ;;  %v85_v1 = vld [vmem:[%s763_s1 + $0x1f8] sm:$0xff]  ;;  %v82_v2 = vld [vmem:[%s763_s1 + $0x1e0] sm:$0xff]  ;;  %172 = vmatprep.mubr.f32.mxu0 %v371_v3  ;;  %285 = vmatprep.mubr.f32.mxu1 %v371_v3 }
   0x2   :  { %108 = vmatprep.subr.mxu0 %v83_v0  ;;  %221 = vmatprep.subr.mxu1 %v85_v1  ;;  %v84_v4 = vld [vmem:[%s763_s1 + $0x1f0] sm:$0xff]  ;;  %v79_v5 = vld [vmem:[%s763_s1 + $0x1c8] sm:$0xff]  ;;  %v81_v6 = vld [vmem:[%s763_s1 + $0x1d8] sm:$0xff] }
   0x3   :  { %109 = vmatpush1.msra.mxu0 %v82_v2  ;;  %222 = vmatpush1.msra.mxu1 %v84_v4  ;;  %v78_v7 = vld [vmem:[%s763_s1 + $0x1c0] sm:$0xff]  ;;  %v80_v8 = vld [vmem:[%s763_s1 + $0x1d0] sm:$0xff]  ;;  %v75_v9 = vld [vmem:[%s763_s1 + $0x1a8] sm:$0xff] }
   0x4   :  { %110 = vmatprep.subr.mxu0 %v79_v5  ;;  %223 = vmatprep.subr.mxu1 %v81_v6  ;;  %v77_v10 = vld [vmem:[%s763_s1 + $0x1b8] sm:$0xff]  ;;  %v74_v11 = vld [vmem:[%s763_s1 + $0x1a0] sm:$0xff]  ;;  %v76_v12 = vld [vmem:[%s763_s1 + $0x1b0] sm:$0xff] }
   0x5   :  { %111 = vmatpush1.msra.mxu0 %v78_v7  ;;  %224 = vmatpush1.msra.mxu1 %v80_v8  ;;  %v71_v13 = vld [vmem:[%s763_s1 + $0x188] sm:$0xff]  ;;  %v73_v14 = vld [vmem:[%s763_s1 + $0x198] sm:$0xff]  ;;  %v70_v15 = vld [vmem:[%s763_s1 + $0x180] sm:$0xff] }
   0x6   :  { %112 = vmatprep.subr.mxu0 %v75_v9  ;;  %225 = vmatprep.subr.mxu1 %v77_v10  ;;  %v72_v16 = vld [vmem:[%s763_s1 + $0x190] sm:$0xff]  ;;  %v67_v17 = vld [vmem:[%s763_s1 + $0x168] sm:$0xff]  ;;  %v69_v18 = vld [vmem:[%s763_s1 + $0x178] sm:$0xff]  ;;  %v88_v10 = vlaneseq }
   0x7   :  { %113 = vmatpush1.msra.mxu0 %v74_v11  ;;  %226 = vmatpush1.msra.mxu1 %v76_v12  ;;  %v66_v19 = vld [vmem:[%s763_s1 + $0x160] sm:$0xff]  ;;  %v68_v20 = vld [vmem:[%s763_s1 + $0x170] sm:$0xff]  ;;  %v63_v21 = vld [vmem:[%s763_s1 + $0x148] sm:$0xff] }
   0x8   :  { %114 = vmatprep.subr.mxu0 %v71_v13  ;;  %227 = vmatprep.subr.mxu1 %v73_v14  ;;  %v65_v22 = vld [vmem:[%s763_s1 + $0x158] sm:$0xff]  ;;  %v62_v23 = vld [vmem:[%s763_s1 + $0x140] sm:$0xff]  ;;  %v64_v24 = vld [vmem:[%s763_s1 + $0x150] sm:$0xff]  ;;  %v89_v11 = vshrl.u32 %v88_v10, 7 }
   0x9   :  { %115 = vmatpush1.msra.mxu0 %v70_v15  ;;  %228 = vmatpush1.msra.mxu1 %v72_v16  ;;  %v59_v25 = vld [vmem:[%s763_s1 + $0x128] sm:$0xff]  ;;  %v61_v26 = vld [vmem:[%s763_s1 + $0x138] sm:$0xff]  ;;  %v58_v27 = vld [vmem:[%s763_s1 + $0x120] sm:$0xff] }
   0xa   :  { %116 = vmatprep.subr.mxu0 %v67_v17  ;;  %229 = vmatprep.subr.mxu1 %v69_v18  ;;  %v60_v28 = vld [vmem:[%s763_s1 + $0x130] sm:$0xff]  ;;  %v55_v29 = vld [vmem:[%s763_s1 + $0x108] sm:$0xff]  ;;  %v57_v30 = vld [vmem:[%s763_s1 + $0x118] sm:$0xff]  ;;  %v90_v12 = vsub.s32 0, %v89_v11  ;;  %v98_v13 = vsub.s32 2, %v89_v11  ;;  %v94_v15 = vsub.s32 1, %v89_v11 }
   0xb   :  { %117 = vmatpush1.msra.mxu0 %v66_v19  ;;  %230 = vmatpush1.msra.mxu1 %v68_v20  ;;  %v54_v31 = vld [vmem:[%s763_s1 + $0x100] sm:$0xff]  ;;  %v56_v32 = vld [vmem:[%s763_s1 + $0x110] sm:$0xff]  ;;  %v51_v33 = vld [vmem:[%s763_s1 + $0xe8] sm:$0xff]  ;;  %v102_v16 = vsub.s32 3, %v89_v11 }
   0xc   :  { %118 = vmatprep.subr.mxu0 %v63_v21  ;;  %231 = vmatprep.subr.mxu1 %v65_v22  ;;  %v53_v34 = vld [vmem:[%s763_s1 + $0xf8] sm:$0xff]  ;;  %v50_v35 = vld [vmem:[%s763_s1 + $0xe0] sm:$0xff]  ;;  %v52_v36 = vld [vmem:[%s763_s1 + $0xf0] sm:$0xff] }
   0xd   :  { %119 = vmatpush1.msra.mxu0 %v62_v23  ;;  %232 = vmatpush1.msra.mxu1 %v64_v24  ;;  %v47_v37 = vld [vmem:[%s763_s1 + $0xc8] sm:$0xff]  ;;  %v49_v38 = vld [vmem:[%s763_s1 + $0xd8] sm:$0xff]  ;;  %v46_v39 = vld [vmem:[%s763_s1 + $0xc0] sm:$0xff] }
   0xe   :  { %120 = vmatprep.subr.mxu0 %v59_v25  ;;  %233 = vmatprep.subr.mxu1 %v61_v26  ;;  %v48_v40 = vld [vmem:[%s763_s1 + $0xd0] sm:$0xff]  ;;  %v43_v41 = vld [vmem:[%s763_s1 + $0xa8] sm:$0xff]  ;;  %v45_v42 = vld [vmem:[%s763_s1 + $0xb8] sm:$0xff] }
   0xf   :  { %121 = vmatpush1.msra.mxu0 %v58_v27  ;;  %234 = vmatpush1.msra.mxu1 %v60_v28  ;;  %v42_v43 = vld [vmem:[%s763_s1 + $0xa0] sm:$0xff]  ;;  %v44_v44 = vld [vmem:[%s763_s1 + $0xb0] sm:$0xff]  ;;  %v39_v45 = vld [vmem:[%s763_s1 + $0x88] sm:$0xff] }
  0x10   :  { %122 = vmatprep.subr.mxu0 %v55_v29  ;;  %235 = vmatprep.subr.mxu1 %v57_v30  ;;  %v41_v46 = vld [vmem:[%s763_s1 + $0x98] sm:$0xff]  ;;  %v38_v47 = vld [vmem:[%s763_s1 + $0x80] sm:$0xff]  ;;  %v40_v48 = vld [vmem:[%s763_s1 + $0x90] sm:$0xff] }
  0x11   :  { %123 = vmatpush1.msra.mxu0 %v54_v31  ;;  %236 = vmatpush1.msra.mxu1 %v56_v32  ;;  %v35_v49 = vld [vmem:[%s763_s1 + $0x68] sm:$0xff]  ;;  %v37_v50 = vld [vmem:[%s763_s1 + $0x78] sm:$0xff]  ;;  %v34_v51 = vld [vmem:[%s763_s1 + $0x60] sm:$0xff] }
  0x12   :  { %124 = vmatprep.subr.mxu0 %v51_v33  ;;  %237 = vmatprep.subr.mxu1 %v53_v34  ;;  %v36_v52 = vld [vmem:[%s763_s1 + $0x70] sm:$0xff]  ;;  %v31_v53 = vld [vmem:[%s763_s1 + $0x48] sm:$0xff]  ;;  %v33_v54 = vld [vmem:[%s763_s1 + $0x58] sm:$0xff] }
  0x13   :  { %125 = vmatpush1.msra.mxu0 %v50_v35  ;;  %238 = vmatpush1.msra.mxu1 %v52_v36  ;;  %v30_v55 = vld [vmem:[%s763_s1 + $0x40] sm:$0xff]  ;;  %v32_v56 = vld [vmem:[%s763_s1 + $0x50] sm:$0xff]  ;;  %v27_v57 = vld [vmem:[%s763_s1 + $0x28] sm:$0xff] }
  0x14   :  { %126 = vmatprep.subr.mxu0 %v47_v37  ;;  %239 = vmatprep.subr.mxu1 %v49_v38  ;;  %v29_v58 = vld [vmem:[%s763_s1 + $0x38] sm:$0xff]  ;;  %v26_v59 = vld [vmem:[%s763_s1 + $0x20] sm:$0xff]  ;;  %v28_v60 = vld [vmem:[%s763_s1 + $0x30] sm:$0xff] }
  0x15   :  { %127 = vmatpush1.msra.mxu0 %v46_v39  ;;  %240 = vmatpush1.msra.mxu1 %v48_v40  ;;  %v23_v61 = vld [vmem:[%s763_s1 + $0x8] sm:$0xff]  ;;  %v25_v62 = vld [vmem:[%s763_s1 + $0x18] sm:$0xff]  ;;  %v22_v63 = vld [vmem:[%s763_s1] sm:$0xff] }
  0x16   :  { %128 = vmatprep.subr.mxu0 %v43_v41  ;;  %241 = vmatprep.subr.mxu1 %v45_v42  ;;  %v24_v0 = vld [vmem:[%s763_s1 + $0x10] sm:$0xff]  ;;  %v14_v1 = vld [vmem:[%s764_s0] sm:$0xff]  ;;  %v15_v2 = vld [vmem:[%s764_s0 + $0x8] sm:$0xff] }
  0x17   :  { %129 = vmatpush1.msra.mxu0 %v42_v43  ;;  %242 = vmatpush1.msra.mxu1 %v44_v44  ;;  %v16_v4 = vld [vmem:[%s764_s0 + $0x10] sm:$0xff]  ;;  %v17_v5 = vld [vmem:[%s764_s0 + $0x18] sm:$0xff]  ;;  %v18_v6 = vld [vmem:[%s764_s0 + $0x20] sm:$0xff] }
  0x18   :  { %130 = vmatprep.subr.mxu0 %v39_v45  ;;  %243 = vmatprep.subr.mxu1 %v41_v46  ;;  %v19_v7 = vld [vmem:[%s764_s0 + $0x28] sm:$0xff]  ;;  %v20_v8 = vld [vmem:[%s764_s0 + $0x30] sm:$0xff]  ;;  %v21_v9 = vld [vmem:[%s764_s0 + $0x38] sm:$0xff] }
  0x19   :  { %131 = vmatpush1.msra.mxu0 %v38_v47  ;;  %244 = vmatpush1.msra.mxu1 %v40_v48  ;;  %v86_v14 = vld [vmem:[%s765_s2] sm:$0xf] }
  0x1a   :  { %132 = vmatprep.subr.mxu0 %v35_v49  ;;  %245 = vmatprep.subr.mxu1 %v37_v50  ;;  %v627_v17 = vrot.slane %v86_v14, %v90_v12  ;;  %v629_v18 = vrot.slane %v86_v14, %v98_v13  ;;  %v633_v19 = vrot.slane %v86_v14, %v102_v16 }
  0x1b   :  { %133 = vmatpush1.msra.mxu0 %v34_v51  ;;  %246 = vmatpush1.msra.mxu1 %v36_v52 }
  0x1c   :  { %134 = vmatprep.subr.mxu0 %v31_v53  ;;  %247 = vmatprep.subr.mxu1 %v33_v54 }
  0x1d   :  { %135 = vmatpush1.msra.mxu0 %v30_v55  ;;  %248 = vmatpush1.msra.mxu1 %v32_v56 }
  0x1e   :  { %136 = vmatprep.subr.mxu0 %v27_v57  ;;  %249 = vmatprep.subr.mxu1 %v29_v58 }
  0x1f   :  { %137 = vmatpush1.msra.mxu0 %v26_v59  ;;  %250 = vmatpush1.msra.mxu1 %v28_v60 }
  0x20   :  { %138 = vmatprep.subr.mxu0 %v23_v61  ;;  %251 = vmatprep.subr.mxu1 %v25_v62 }
  0x21   :  { %139 = vmatpush1.msra.mxu0 %v22_v63  ;;  %252 = vmatpush1.msra.mxu1 %v24_v0 }
  0x22   :  { %173 = vmatmul.mubr.f32.vlgmr.msra.gmra.mxu0 %v14_v1  ;;  %286 = vmatmul.mubr.f32.vlgmr.msra.gmra.mxu1 %v14_v1 }
  0x23   :  { %178 = vmatprep.mubr.f32.mxu0 %v371_v3  ;;  %291 = vmatprep.mubr.f32.mxu1 %v371_v3 }
  0x26   :  { %179 = vmatmul.mubr.f32.gmra.mxu0 %v15_v2  ;;  %292 = vmatmul.mubr.f32.gmra.mxu1 %v15_v2 }
  0x27   :  { %184 = vmatprep.mubr.f32.mxu0 %v371_v3  ;;  %297 = vmatprep.mubr.f32.mxu1 %v371_v3 }
  0x2a   :  { %185 = vmatmul.mubr.f32.gmra.mxu0 %v16_v4  ;;  %298 = vmatmul.mubr.f32.gmra.mxu1 %v16_v4 }
  0x2b   :  { %190 = vmatprep.mubr.f32.mxu0 %v371_v3  ;;  %303 = vmatprep.mubr.f32.mxu1 %v371_v3 }
  0x2e   :  { %191 = vmatmul.mubr.f32.gmra.mxu0 %v17_v5  ;;  %304 = vmatmul.mubr.f32.gmra.mxu1 %v17_v5 }
  0x2f   :  { %196 = vmatprep.mubr.f32.mxu0 %v371_v3  ;;  %309 = vmatprep.mubr.f32.mxu1 %v371_v3 }
  0x32   :  { %197 = vmatmul.mubr.f32.gmra.mxu0 %v18_v6  ;;  %310 = vmatmul.mubr.f32.gmra.mxu1 %v18_v6 }
  0x33   :  { %202 = vmatprep.mubr.f32.mxu0 %v371_v3  ;;  %315 = vmatprep.mubr.f32.mxu1 %v371_v3 }
  0x36   :  { %203 = vmatmul.mubr.f32.gmra.mxu0 %v19_v7  ;;  %316 = vmatmul.mubr.f32.gmra.mxu1 %v19_v7 }
  0x37   :  { %208 = vmatprep.mubr.f32.mxu0 %v371_v3  ;;  %321 = vmatprep.mubr.f32.mxu1 %v371_v3 }
  0x3a   :  { %209 = vmatmul.mubr.f32.gmra.mxu0 %v20_v8  ;;  %322 = vmatmul.mubr.f32.gmra.mxu1 %v20_v8 }
  0x3b   :  { %214 = vmatprep.mubr.f32.mxu0 %v371_v3  ;;  %327 = vmatprep.mubr.f32.mxu1 %v371_v3  ;;  %v631_v3 = vrot.slane %v86_v14, %v94_v15 }
  0x3e   :  { %215 = vmatmul.mubr.f32.gmra.mxu0 %v21_v9  ;;  %328 = vmatmul.mubr.f32.gmra.mxu1 %v21_v9 }
  0xe2   :  { %v174_v20 = vpop.f32.mrf.mxu0  ;;  %v287_v21 = vpop.f32.mrf.mxu1 }
  0xe3   :  { %v175_v22 = vadd.f32 %v174_v20, %v627_v17  ;;  %v288_v23 = vadd.f32 %v287_v21, %v629_v18 }
  0xe4   :  { %v176_v24 = vpop.f32.mrf.mxu0  ;;  %v289_v25 = vpop.f32.mrf.mxu1 }
  0xe5   :  { %334 = vst [vmem:[%s766_s3] sm:$0xff] %v175_v22  ;;  %336 = vst [vmem:[%s766_s3 + $0x10] sm:$0xff] %v288_v23  ;;  %v177_v26 = vadd.f32 %v176_v24, %v631_v3  ;;  %v290_v27 = vadd.f32 %v289_v25, %v633_v19 }
  0xe6   :  { %v180_v28 = vpop.f32.mrf.mxu0  ;;  %v293_v29 = vpop.f32.mrf.mxu1 }
  0xe7   :  { %335 = vst [vmem:[%s766_s3 + $0x8] sm:$0xff] %v177_v26  ;;  %337 = vst [vmem:[%s766_s3 + $0x18] sm:$0xff] %v290_v27  ;;  %v181_v30 = vadd.f32 %v180_v28, %v627_v17  ;;  %v294_v31 = vadd.f32 %v293_v29, %v629_v18 }
  0xe8   :  { %v182_v32 = vpop.f32.mrf.mxu0  ;;  %v295_v33 = vpop.f32.mrf.mxu1 }
  0xe9   :  { %338 = vst [vmem:[%s766_s3 + $0x20] sm:$0xff] %v181_v30  ;;  %340 = vst [vmem:[%s766_s3 + $0x30] sm:$0xff] %v294_v31  ;;  %v183_v34 = vadd.f32 %v182_v32, %v631_v3  ;;  %v296_v35 = vadd.f32 %v295_v33, %v633_v19 }
  0xea   :  { %v186_v36 = vpop.f32.mrf.mxu0  ;;  %v299_v37 = vpop.f32.mrf.mxu1 }
  0xeb   :  { %339 = vst [vmem:[%s766_s3 + $0x28] sm:$0xff] %v183_v34  ;;  %341 = vst [vmem:[%s766_s3 + $0x38] sm:$0xff] %v296_v35  ;;  %v187_v38 = vadd.f32 %v186_v36, %v627_v17  ;;  %v300_v39 = vadd.f32 %v299_v37, %v629_v18 }
  0xec   :  { %v188_v40 = vpop.f32.mrf.mxu0  ;;  %v301_v41 = vpop.f32.mrf.mxu1 }
  0xed   :  { %342 = vst [vmem:[%s766_s3 + $0x40] sm:$0xff] %v187_v38  ;;  %344 = vst [vmem:[%s766_s3 + $0x50] sm:$0xff] %v300_v39  ;;  %v189_v42 = vadd.f32 %v188_v40, %v631_v3  ;;  %v302_v43 = vadd.f32 %v301_v41, %v633_v19 }
  0xee   :  { %v192_v44 = vpop.f32.mrf.mxu0  ;;  %v305_v45 = vpop.f32.mrf.mxu1 }
  0xef   :  { %343 = vst [vmem:[%s766_s3 + $0x48] sm:$0xff] %v189_v42  ;;  %345 = vst [vmem:[%s766_s3 + $0x58] sm:$0xff] %v302_v43  ;;  %v193_v46 = vadd.f32 %v192_v44, %v627_v17  ;;  %v306_v47 = vadd.f32 %v305_v45, %v629_v18 }
  0xf0   :  { %v194_v48 = vpop.f32.mrf.mxu0  ;;  %v307_v49 = vpop.f32.mrf.mxu1 }
  0xf1   :  { %346 = vst [vmem:[%s766_s3 + $0x60] sm:$0xff] %v193_v46  ;;  %348 = vst [vmem:[%s766_s3 + $0x70] sm:$0xff] %v306_v47  ;;  %v195_v50 = vadd.f32 %v194_v48, %v631_v3  ;;  %v308_v51 = vadd.f32 %v307_v49, %v633_v19 }
  0xf2   :  { %v198_v52 = vpop.f32.mrf.mxu0  ;;  %v311_v53 = vpop.f32.mrf.mxu1 }
  0xf3   :  { %347 = vst [vmem:[%s766_s3 + $0x68] sm:$0xff] %v195_v50  ;;  %349 = vst [vmem:[%s766_s3 + $0x78] sm:$0xff] %v308_v51  ;;  %v199_v54 = vadd.f32 %v198_v52, %v627_v17  ;;  %v312_v55 = vadd.f32 %v311_v53, %v629_v18 }
  0xf4   :  { %v200_v56 = vpop.f32.mrf.mxu0  ;;  %v313_v57 = vpop.f32.mrf.mxu1 }
  0xf5   :  { %350 = vst [vmem:[%s766_s3 + $0x80] sm:$0xff] %v199_v54  ;;  %352 = vst [vmem:[%s766_s3 + $0x90] sm:$0xff] %v312_v55  ;;  %v201_v58 = vadd.f32 %v200_v56, %v631_v3  ;;  %v314_v59 = vadd.f32 %v313_v57, %v633_v19 }
  0xf6   :  { %v204_v60 = vpop.f32.mrf.mxu0  ;;  %v317_v61 = vpop.f32.mrf.mxu1 }
  0xf7   :  { %351 = vst [vmem:[%s766_s3 + $0x88] sm:$0xff] %v201_v58  ;;  %353 = vst [vmem:[%s766_s3 + $0x98] sm:$0xff] %v314_v59  ;;  %v205_v62 = vadd.f32 %v204_v60, %v627_v17  ;;  %v318_v63 = vadd.f32 %v317_v61, %v629_v18 }
  0xf8   :  { %v206_v0 = vpop.f32.mrf.mxu0  ;;  %v319_v1 = vpop.f32.mrf.mxu1 }
  0xf9   :  { %354 = vst [vmem:[%s766_s3 + $0xa0] sm:$0xff] %v205_v62  ;;  %356 = vst [vmem:[%s766_s3 + $0xb0] sm:$0xff] %v318_v63  ;;  %v207_v2 = vadd.f32 %v206_v0, %v631_v3  ;;  %v320_v4 = vadd.f32 %v319_v1, %v633_v19 }
  0xfa   :  { %v210_v5 = vpop.f32.mrf.mxu0  ;;  %v323_v6 = vpop.f32.mrf.mxu1 }
  0xfb   :  { %355 = vst [vmem:[%s766_s3 + $0xa8] sm:$0xff] %v207_v2  ;;  %357 = vst [vmem:[%s766_s3 + $0xb8] sm:$0xff] %v320_v4  ;;  %v211_v7 = vadd.f32 %v210_v5, %v627_v17  ;;  %v324_v8 = vadd.f32 %v323_v6, %v629_v18 }
  0xfc   :  { %v212_v9 = vpop.f32.mrf.mxu0  ;;  %v325_v10 = vpop.f32.mrf.mxu1 }
  0xfd   :  { %358 = vst [vmem:[%s766_s3 + $0xc0] sm:$0xff] %v211_v7  ;;  %360 = vst [vmem:[%s766_s3 + $0xd0] sm:$0xff] %v324_v8  ;;  %v213_v11 = vadd.f32 %v212_v9, %v631_v3  ;;  %v326_v12 = vadd.f32 %v325_v10, %v633_v19 }
  0xfe   :  { %v216_v13 = vpop.f32.mrf.mxu0  ;;  %v329_v14 = vpop.f32.mrf.mxu1 }
  0xff   :  { %359 = vst [vmem:[%s766_s3 + $0xc8] sm:$0xff] %v213_v11  ;;  %361 = vst [vmem:[%s766_s3 + $0xd8] sm:$0xff] %v326_v12  ;;  %v217_v15 = vadd.f32 %v216_v13, %v627_v17  ;;  %v330_v16 = vadd.f32 %v329_v14, %v629_v18 }
 0x100   :  { %v218_v20 = vpop.f32.mrf.mxu0  ;;  %v331_v21 = vpop.f32.mrf.mxu1 }
 0x101   :  { %362 = vst [vmem:[%s766_s3 + $0xe0] sm:$0xff] %v217_v15  ;;  %364 = vst [vmem:[%s766_s3 + $0xf0] sm:$0xff] %v330_v16  ;;  %v219_v22 = vadd.f32 %v218_v20, %v631_v3  ;;  %v332_v23 = vadd.f32 %v331_v21, %v633_v19 }
 0x103   :  { %363 = vst [vmem:[%s766_s3 + $0xe8] sm:$0xff] %v219_v22  ;;  %365 = vst [vmem:[%s766_s3 + $0xf8] sm:$0xff] %v332_v23 }

// kernel: decoder_rnn_forward.4
= control target key start
LH: loop header
LB: loop body
LE: loop exit
PB: predicated region body
PF: predicated region fallthrough
CT: control target
= control target key end

     0   :  { %v3090_v3 = vmov 0.0   ;;  %s3085_s1 = inlined_call_operand.vmem [shape: f32[128,512], index: 1, kind: input, shape index: {}]   ;;  %s3086_s0 = inlined_call_operand.vmem [shape: f32[8,8,512], index: 0, kind: input, shape index: {}]   ;;  %s3087_s2 = inlined_call_operand.vmem [shape: f32[8,8,128], index: 2, kind: output, shape index: {}]  }
   0x1   :  { %v1774_v0 = vld [vmem:[%s3085_s1 + $0x1e8] sm:$0xff]  ;;  %v1779_v1 = vld [vmem:[%s3085_s1 + $0x1e0] sm:$0xff]  ;;  %151 = vmatprep.mubr.f32.mxu0 %v3090_v3  ;;  %222 = vmatprep.mubr.f32.mxu1 %v3090_v3  ;;  %v1821_v9 = vld [vmem:[%s3085_s1 + $0x1f8] sm:$0xff] }
   0x2   :  { %3157 = vst [vmem:[#allocation4_spill] sm:$0xff] %v1774_v0  ;;  %v1784_v2 = vld [vmem:[%s3085_s1 + $0x1c8] sm:$0xff]  ;;  %87 = vmatprep.subr.mxu0 %v1774_v0  ;;  %v1792_v4 = vld [vmem:[%s3085_s1 + $0x1c0] sm:$0xff]  ;;  %3158 = vst [vmem:[#allocation5_spill] sm:$0xff] %v1821_v9  ;;  %158 = vmatprep.subr.mxu1 %v1821_v9 }
   0x3   :  { %88 = vmatpush1.msra.mxu0 %v1779_v1  ;;  %v1798_v5 = vld [vmem:[%s3085_s1 + $0x1a8] sm:$0xff]  ;;  %v1804_v6 = vld [vmem:[%s3085_s1 + $0x1a0] sm:$0xff]  ;;  %v1833_v11 = vld [vmem:[%s3085_s1 + $0x1f0] sm:$0xff] }
   0x4   :  { %89 = vmatprep.subr.mxu0 %v1784_v2  ;;  %v1810_v7 = vld [vmem:[%s3085_s1 + $0x188] sm:$0xff]  ;;  %v1816_v8 = vld [vmem:[%s3085_s1 + $0x180] sm:$0xff]  ;;  %159 = vmatpush1.msra.mxu1 %v1833_v11  ;;  %v1845_v13 = vld [vmem:[%s3085_s1 + $0x1d8] sm:$0xff] }
   0x5   :  { %90 = vmatpush1.msra.mxu0 %v1792_v4  ;;  %v1827_v10 = vld [vmem:[%s3085_s1 + $0x168] sm:$0xff]  ;;  %v1839_v12 = vld [vmem:[%s3085_s1 + $0x160] sm:$0xff]  ;;  %v1850_v14 = vld [vmem:[%s3085_s1 + $0x1d0] sm:$0xff]  ;;  %160 = vmatprep.subr.mxu1 %v1845_v13 }
   0x6   :  { %91 = vmatprep.subr.mxu0 %v1798_v5  ;;  %v1856_v15 = vld [vmem:[%s3085_s1 + $0x148] sm:$0xff]  ;;  %v1862_v16 = vld [vmem:[%s3085_s1 + $0x1b8] sm:$0xff]  ;;  %v1868_v17 = vld [vmem:[%s3085_s1 + $0x140] sm:$0xff]  ;;  %161 = vmatpush1.msra.mxu1 %v1850_v14 }
   0x7   :  { %92 = vmatpush1.msra.mxu0 %v1804_v6  ;;  %v1874_v18 = vld [vmem:[%s3085_s1 + $0x1b0] sm:$0xff]  ;;  %v1879_v19 = vld [vmem:[%s3085_s1 + $0x198] sm:$0xff]  ;;  %v1885_v20 = vld [vmem:[%s3085_s1 + $0x128] sm:$0xff]  ;;  %162 = vmatprep.subr.mxu1 %v1862_v16 }
   0x8   :  { %93 = vmatprep.subr.mxu0 %v1810_v7  ;;  %v1891_v21 = vld [vmem:[%s3085_s1 + $0x190] sm:$0xff]  ;;  %v1897_v22 = vld [vmem:[%s3085_s1 + $0x120] sm:$0xff]  ;;  %163 = vmatpush1.msra.mxu1 %v1874_v18  ;;  %v1903_v23 = vld [vmem:[%s3085_s1 + $0x178] sm:$0xff] }
   0x9   :  { %94 = vmatpush1.msra.mxu0 %v1816_v8  ;;  %v1909_v24 = vld [vmem:[%s3085_s1 + $0x108] sm:$0xff]  ;;  %164 = vmatprep.subr.mxu1 %v1879_v19  ;;  %v1915_v25 = vld [vmem:[%s3085_s1 + $0x170] sm:$0xff]  ;;  %v1921_v26 = vld [vmem:[%s3085_s1 + $0x100] sm:$0xff] }
   0xa   :  { %95 = vmatprep.subr.mxu0 %v1827_v10  ;;  %165 = vmatpush1.msra.mxu1 %v1891_v21  ;;  %v1927_v27 = vld [vmem:[%s3085_s1 + $0x158] sm:$0xff]  ;;  %v1933_v28 = vld [vmem:[%s3085_s1 + $0xe8] sm:$0xff]  ;;  %v1939_v29 = vld [vmem:[%s3085_s1 + $0x150] sm:$0xff] }
   0xb   :  { %96 = vmatpush1.msra.mxu0 %v1839_v12  ;;  %166 = vmatprep.subr.mxu1 %v1903_v23  ;;  %v1945_v30 = vld [vmem:[%s3085_s1 + $0xe0] sm:$0xff]  ;;  %v1951_v31 = vld [vmem:[%s3085_s1 + $0x138] sm:$0xff]  ;;  %v1957_v32 = vld [vmem:[%s3085_s1 + $0xc8] sm:$0xff] }
   0xc   :  { %97 = vmatprep.subr.mxu0 %v1856_v15  ;;  %167 = vmatpush1.msra.mxu1 %v1915_v25  ;;  %v1963_v33 = vld [vmem:[%s3085_s1 + $0x130] sm:$0xff]  ;;  %v1969_v34 = vld [vmem:[%s3085_s1 + $0xc0] sm:$0xff]  ;;  %v1975_v35 = vld [vmem:[%s3085_s1 + $0x118] sm:$0xff] }
   0xd   :  { %98 = vmatpush1.msra.mxu0 %v1868_v17  ;;  %168 = vmatprep.subr.mxu1 %v1927_v27  ;;  %v1981_v36 = vld [vmem:[%s3085_s1 + $0xa8] sm:$0xff]  ;;  %v1987_v37 = vld [vmem:[%s3085_s1 + $0x110] sm:$0xff]  ;;  %v1993_v38 = vld [vmem:[%s3085_s1 + $0xa0] sm:$0xff] }
   0xe   :  { %99 = vmatprep.subr.mxu0 %v1885_v20  ;;  %169 = vmatpush1.msra.mxu1 %v1939_v29  ;;  %v1999_v39 = vld [vmem:[%s3085_s1 + $0xf8] sm:$0xff]  ;;  %v2005_v40 = vld [vmem:[%s3085_s1 + $0x88] sm:$0xff]  ;;  %v2011_v41 = vld [vmem:[%s3085_s1 + $0xf0] sm:$0xff] }
   0xf   :  { %100 = vmatpush1.msra.mxu0 %v1897_v22  ;;  %170 = vmatprep.subr.mxu1 %v1951_v31  ;;  %v2017_v42 = vld [vmem:[%s3085_s1 + $0x80] sm:$0xff]  ;;  %v2023_v43 = vld [vmem:[%s3085_s1 + $0xd8] sm:$0xff]  ;;  %v2029_v44 = vld [vmem:[%s3085_s1 + $0x68] sm:$0xff] }
  0x10   :  { %101 = vmatprep.subr.mxu0 %v1909_v24  ;;  %171 = vmatpush1.msra.mxu1 %v1963_v33  ;;  %3159 = vst [vmem:[#allocation6_spill] sm:$0xff] %v2029_v44  ;;  %v2035_v45 = vld [vmem:[%s3085_s1 + $0xd0] sm:$0xff]  ;;  %v2041_v46 = vld [vmem:[%s3085_s1 + $0x60] sm:$0xff]  ;;  %v2047_v47 = vld [vmem:[%s3085_s1 + $0xb8] sm:$0xff] }
  0x11   :  { %102 = vmatpush1.msra.mxu0 %v1921_v26  ;;  %172 = vmatprep.subr.mxu1 %v1975_v35  ;;  %3160 = vst [vmem:[#allocation7_spill] sm:$0xff] %v2041_v46  ;;  %v2053_v48 = vld [vmem:[%s3085_s1 + $0x48] sm:$0xff]  ;;  %v2059_v49 = vld [vmem:[%s3085_s1 + $0xb0] sm:$0xff]  ;;  %v2065_v50 = vld [vmem:[%s3085_s1 + $0x40] sm:$0xff] }
  0x12   :  { %103 = vmatprep.subr.mxu0 %v1933_v28  ;;  %173 = vmatpush1.msra.mxu1 %v1987_v37  ;;  %3161 = vst [vmem:[#allocation8_spill] sm:$0xff] %v2053_v48  ;;  %3162 = vst [vmem:[#allocation9_spill] sm:$0xff] %v2065_v50  ;;  %v2071_v51 = vld [vmem:[%s3085_s1 + $0x98] sm:$0xff]  ;;  %v2077_v52 = vld [vmem:[%s3085_s1 + $0x28] sm:$0xff] }
  0x13   :  { %104 = vmatpush1.msra.mxu0 %v1945_v30  ;;  %174 = vmatprep.subr.mxu1 %v1999_v39  ;;  %3163 = vst [vmem:[#allocation10_spill] sm:$0xff] %v2077_v52  ;;  %v2083_v53 = vld [vmem:[%s3085_s1 + $0x90] sm:$0xff]  ;;  %v2089_v54 = vld [vmem:[%s3085_s1 + $0x20] sm:$0xff]  ;;  %v2095_v55 = vld [vmem:[%s3085_s1 + $0x78] sm:$0xff] }
  0x14   :  { %105 = vmatprep.subr.mxu0 %v1957_v32  ;;  %175 = vmatpush1.msra.mxu1 %v2011_v41  ;;  %3164 = vst [vmem:[#allocation11_spill] sm:$0xff] %v2083_v53  ;;  %3165 = vst [vmem:[#allocation12_spill] sm:$0xff] %v2089_v54  ;;  %v2101_v56 = vld [vmem:[%s3085_s1 + $0x8] sm:$0xff]  ;;  %v2107_v57 = vld [vmem:[%s3085_s1 + $0x70] sm:$0xff] }
  0x15   :  { %106 = vmatpush1.msra.mxu0 %v1969_v34  ;;  %176 = vmatprep.subr.mxu1 %v2023_v43  ;;  %3166 = vst [vmem:[#allocation13_spill] sm:$0xff] %v2095_v55  ;;  %3167 = vst [vmem:[#allocation14_spill] sm:$0xff] %v2101_v56  ;;  %v2113_v58 = vld [vmem:[%s3085_s1] sm:$0xff]  ;;  %v2119_v59 = vld [vmem:[%s3085_s1 + $0x58] sm:$0xff] }
  0x16   :  { %107 = vmatprep.subr.mxu0 %v1981_v36  ;;  %177 = vmatpush1.msra.mxu1 %v2035_v45  ;;  %3168 = vst [vmem:[#allocation15_spill] sm:$0xff] %v2107_v57  ;;  %3169 = vst [vmem:[#allocation16_spill] sm:$0xff] %v2113_v58  ;;  %v2126_v60 = vld [vmem:[%s3085_s1 + $0x50] sm:$0xff]  ;;  %v2133_v61 = vld [vmem:[%s3085_s1 + $0x38] sm:$0xff] }
  0x17   :  { %108 = vmatpush1.msra.mxu0 %v1993_v38  ;;  %178 = vmatprep.subr.mxu1 %v2047_v47  ;;  %3170 = vst [vmem:[#allocation17_spill] sm:$0xff] %v2119_v59  ;;  %3171 = vst [vmem:[#allocation18_spill] sm:$0xff] %v2126_v60  ;;  %v2140_v62 = vld [vmem:[%s3085_s1 + $0x30] sm:$0xff]  ;;  %v2147_v63 = vld [vmem:[%s3085_s1 + $0x18] sm:$0xff] }
  0x18   :  { %109 = vmatprep.subr.mxu0 %v2005_v40  ;;  %179 = vmatpush1.msra.mxu1 %v2059_v49  ;;  %3172 = vst [vmem:[#allocation19_spill] sm:$0xff] %v2133_v61  ;;  %3173 = vst [vmem:[#allocation20_spill] sm:$0xff] %v2140_v62 }
  0x19   :  { %110 = vmatpush1.msra.mxu0 %v2017_v42  ;;  %180 = vmatprep.subr.mxu1 %v2071_v51  ;;  %3174 = vst [vmem:[#allocation21_spill] sm:$0xff] %v2147_v63 }
  0x1a   :  { %111 = vmatprep.subr.mxu0 %v2029_v44  ;;  %181 = vmatpush1.msra.mxu1 %v2083_v53 }
  0x1b   :  { %112 = vmatpush1.msra.mxu0 %v2041_v46  ;;  %182 = vmatprep.subr.mxu1 %v2095_v55 }
  0x1c   :  { %113 = vmatprep.subr.mxu0 %v2053_v48  ;;  %183 = vmatpush1.msra.mxu1 %v2107_v57 }
  0x1d   :  { %114 = vmatpush1.msra.mxu0 %v2065_v50  ;;  %184 = vmatprep.subr.mxu1 %v2119_v59 }
  0x1e   :  { %115 = vmatprep.subr.mxu0 %v2077_v52  ;;  %185 = vmatpush1.msra.mxu1 %v2126_v60 }
  0x1f   :  { %116 = vmatpush1.msra.mxu0 %v2089_v54  ;;  %186 = vmatprep.subr.mxu1 %v2133_v61 }
  0x20   :  { %117 = vmatprep.subr.mxu0 %v2101_v56  ;;  %187 = vmatpush1.msra.mxu1 %v2140_v62 }
  0x21   :  { %118 = vmatpush1.msra.mxu0 %v2113_v58  ;;  %v2153_v58 = vld [vmem:[%s3085_s1 + $0x10] sm:$0xff]  ;;  %188 = vmatprep.subr.mxu1 %v2147_v63 }
  0x22   :  { %152 = vmatmul.mubr.f32.vlgmr.msra.gmra.mxu0 %v3090_v3  ;;  %3175 = vst [vmem:[#allocation22_spill] sm:$0xff] %v2153_v58  ;;  %263 = vmatprep.subr.mxu0 %v1774_v0 }
  0x23   :  { %264 = vmatpush1.msra.mxu0 %v1779_v1  ;;  %189 = vmatpush1.msra.mxu1 %v2153_v58 }
  0x24   :  { %265 = vmatprep.subr.mxu0 %v1784_v2  ;;  %223 = vmatmul.mubr.f32.vlgmr.msra.gmra.mxu1 %v3090_v3  ;;  %v3176_v3 = vld [vmem:[#allocation16_spill] sm:$0xff] }
  0x25   :  { %266 = vmatpush1.msra.mxu0 %v1792_v4  ;;  %334 = vmatprep.subr.mxu1 %v1821_v9 }
  0x26   :  { %335 = vmatpush1.msra.mxu1 %v1833_v11  ;;  %267 = vmatprep.subr.mxu0 %v1798_v5 }
  0x27   :  { %336 = vmatprep.subr.mxu1 %v1845_v13  ;;  %268 = vmatpush1.msra.mxu0 %v1804_v6 }
  0x28   :  { %337 = vmatpush1.msra.mxu1 %v1850_v14  ;;  %269 = vmatprep.subr.mxu0 %v1810_v7 }
  0x29   :  { %338 = vmatprep.subr.mxu1 %v1862_v16  ;;  %270 = vmatpush1.msra.mxu0 %v1816_v8 }
  0x2a   :  { %339 = vmatpush1.msra.mxu1 %v1874_v18  ;;  %271 = vmatprep.subr.mxu0 %v1827_v10 }
  0x2b   :  { %340 = vmatprep.subr.mxu1 %v1879_v19  ;;  %272 = vmatpush1.msra.mxu0 %v1839_v12 }
  0x2c   :  { %341 = vmatpush1.msra.mxu1 %v1891_v21  ;;  %273 = vmatprep.subr.mxu0 %v1856_v15 }
  0x2d   :  { %342 = vmatprep.subr.mxu1 %v1903_v23  ;;  %274 = vmatpush1.msra.mxu0 %v1868_v17 }
  0x2e   :  { %343 = vmatpush1.msra.mxu1 %v1915_v25  ;;  %275 = vmatprep.subr.mxu0 %v1885_v20 }
  0x2f   :  { %344 = vmatprep.subr.mxu1 %v1927_v27  ;;  %276 = vmatpush1.msra.mxu0 %v1897_v22 }
  0x30   :  { %345 = vmatpush1.msra.mxu1 %v1939_v29  ;;  %277 = vmatprep.subr.mxu0 %v1909_v24 }
  0x31   :  { %346 = vmatprep.subr.mxu1 %v1951_v31  ;;  %278 = vmatpush1.msra.mxu0 %v1921_v26 }
  0x32   :  { %347 = vmatpush1.msra.mxu1 %v1963_v33  ;;  %279 = vmatprep.subr.mxu0 %v1933_v28 }
  0x33   :  { %348 = vmatprep.subr.mxu1 %v1975_v35  ;;  %280 = vmatpush1.msra.mxu0 %v1945_v30 }
  0x34   :  { %349 = vmatpush1.msra.mxu1 %v1987_v37  ;;  %281 = vmatprep.subr.mxu0 %v1957_v32 }
  0x35   :  { %350 = vmatprep.subr.mxu1 %v1999_v39  ;;  %282 = vmatpush1.msra.mxu0 %v1969_v34 }
  0x36   :  { %351 = vmatpush1.msra.mxu1 %v2011_v41  ;;  %283 = vmatprep.subr.mxu0 %v1981_v36 }
  0x37   :  { %352 = vmatprep.subr.mxu1 %v2023_v43  ;;  %284 = vmatpush1.msra.mxu0 %v1993_v38 }
  0x38   :  { %353 = vmatpush1.msra.mxu1 %v2035_v45  ;;  %285 = vmatprep.subr.mxu0 %v2005_v40 }
  0x39   :  { %354 = vmatprep.subr.mxu1 %v2047_v47  ;;  %286 = vmatpush1.msra.mxu0 %v2017_v42 }
  0x3a   :  { %355 = vmatpush1.msra.mxu1 %v2059_v49  ;;  %287 = vmatprep.subr.mxu0 %v2029_v44 }
  0x3b   :  { %356 = vmatprep.subr.mxu1 %v2071_v51  ;;  %288 = vmatpush1.msra.mxu0 %v2041_v46 }
  0x3c   :  { %357 = vmatpush1.msra.mxu1 %v2083_v53  ;;  %289 = vmatprep.subr.mxu0 %v2053_v48  ;;  %v3177_v48 = vmov 0.0  }
  0x3d   :  { %358 = vmatprep.subr.mxu1 %v2095_v55  ;;  %290 = vmatpush1.msra.mxu0 %v2065_v50 }
  0x3e   :  { %359 = vmatpush1.msra.mxu1 %v2107_v57  ;;  %291 = vmatprep.subr.mxu0 %v2077_v52 }
  0x3f   :  { %360 = vmatprep.subr.mxu1 %v2119_v59  ;;  %292 = vmatpush1.msra.mxu0 %v2089_v54 }
  0x40   :  { %361 = vmatpush1.msra.mxu1 %v2126_v60  ;;  %293 = vmatprep.subr.mxu0 %v2101_v56  ;;  %v83_v56 = vld [vmem:[%s3086_s0] sm:$0xff]  ;;  %v85_v60 = vld [vmem:[%s3086_s0 + $0x10] sm:$0xff] }
  0x41   :  { %362 = vmatprep.subr.mxu1 %v2133_v61  ;;  %294 = vmatpush1.msra.mxu0 %v3176_v3  ;;  %v84_v3 = vld [vmem:[%s3086_s0 + $0x8] sm:$0xff] }
  0x42   :  { %363 = vmatpush1.msra.mxu1 %v2140_v62  ;;  %327 = vmatprep.mubr.f32.mxu0 %v3177_v48 }
  0x43   :  { %364 = vmatprep.subr.mxu1 %v2147_v63  ;;  %398 = vmatprep.mubr.f32.mxu1 %v3177_v48 }
  0x44   :  { %365 = vmatpush1.msra.mxu1 %v2153_v58  ;;  %440 = vmatprep.subr.mxu0 %v1774_v0 }
  0x45   :  { %511 = vmatprep.subr.mxu1 %v1821_v9  ;;  %v86_v9 = vld [vmem:[%s3086_s0 + $0x18] sm:$0xff] }
  0xe2   :  { %v153_v54 = vpop.f32.mrf.mxu0 }
  0xe3   :  { %v229_v62 = vadd.f32 %v153_v54, %v83_v56 }
  0xe4   :  { %v155_v61 = vpop.f32.mrf.mxu0  ;;  %v224_v58 = vpop.f32.mrf.mxu1 }
  0xe5   :  { %v1503_v63 = vmul.f32 -1.442695, %v229_v62  ;;  %v230_v52 = vadd.f32 %v155_v61, %v84_v3  ;;  %v231_v59 = vadd.f32 %v224_v58, %v85_v60  ;;  %v3182_v58 = vld [vmem:[#allocation15_spill] sm:$0xff]  ;;  %v3184_v60 = vld [vmem:[#allocation17_spill] sm:$0xff] }
  0xe6   :  { %v226_v0 = vpop.f32.mrf.mxu1 }
  0xe7   :  { %1563 = vpow2.f32 %v1503_v63  ;;  %v1504_v48 = vmul.f32 -1.442695, %v230_v52  ;;  %v232_v50 = vadd.f32 %v226_v0, %v86_v9 }
  0xe9   :  { %1565 = vpow2.f32 %v1504_v48  ;;  %v1505_v57 = vmul.f32 -1.442695, %v232_v50 }
  0xea   :  { %1567 = vtanh.f32 %v231_v59  ;;  %v3183_v59 = vld [vmem:[#allocation8_spill] sm:$0xff] }
  0xeb   :  { %1569 = vpow2.f32 %v1505_v57  ;;  %v3181_v57 = vld [vmem:[#allocation7_spill] sm:$0xff] }
  0xf4   :  { %v1564_v54 = vpop.eup %1563 }
  0xf5   :  { %v236_v56 = vadd.f32 1.0, %v1564_v54  ;;  %v3185_v54 = vld [vmem:[#allocation9_spill] sm:$0xff] }
  0xf6   :  { %v1566_v3 = vpop.eup %1565 }
  0xf7   :  { %1571 = vrcp.f32 %v236_v56  ;;  %v242_v52 = vadd.f32 1.0, %v1566_v3  ;;  %v1568_v48 = vpop.eup %1567  ;;  %v3186_v56 = vld [vmem:[#allocation18_spill] sm:$0xff] }
  0xf8   :  { %v1570_v61 = vpop.eup %1569  ;;  %v3187_v3 = vld [vmem:[#allocation10_spill] sm:$0xff] }
  0xf9   :  { %1573 = vrcp.f32 %v242_v52  ;;  %v249_v46 = vadd.f32 1.0, %v1570_v61  ;;  %v3188_v52 = vld [vmem:[#allocation19_spill] sm:$0xff]  ;;  %v3190_v61 = vld [vmem:[#allocation20_spill] sm:$0xff] }
  0xfb   :  { %1575 = vrcp.f32 %v249_v46  ;;  %v3179_v46 = vld [vmem:[#allocation6_spill] sm:$0xff] }
 0x104   :  { %v1572_v62 = vpop.eup %1571 }
 0x105   :  { %v253_v44 = vmul.f32 %v1572_v62, %v1568_v48  ;;  %v3189_v48 = vld [vmem:[#allocation12_spill] sm:$0xff]  ;;  %v3191_v62 = vld [vmem:[#allocation14_spill] sm:$0xff] }
 0x106   :  { %v1574_v63 = vpop.eup %1573 }
 0x107   :  { %v252_v55 = vmul.f32 0.0, %v1574_v63  ;;  %v3192_v63 = vld [vmem:[#allocation21_spill] sm:$0xff] }
 0x108   :  { %v1576_v0 = vpop.eup %1575 }
 0x109   :  { %v2239_v53 = vadd.f32 %v253_v44, %v252_v55  ;;  %v3178_v44 = vld [vmem:[#allocation11_spill] sm:$0xff]  ;;  %v3180_v55 = vld [vmem:[#allocation13_spill] sm:$0xff] }
 0x10b   :  { %1577 = vtanh.f32 %v2239_v53 }
 0x118   :  { %v1578_v9 = vpop.eup %1577 }
 0x119   :  { %v256_v50 = vmul.f32 %v1578_v9, %v1576_v0  ;;  %v3193_v0 = vld [vmem:[#allocation16_spill] sm:$0xff]  ;;  %v3194_v9 = vmov 0.0  }
 0x11b   :  { %257 = vst [vmem:[%s3087_s2] sm:$0xff] %v256_v50  ;;  %328 = vmatmul.mubr.f32.vlgmr.msra.gmra.mxu0 %v256_v50  ;;  %399 = vmatmul.mubr.f32.vlgmr.msra.gmra.mxu1 %v256_v50  ;;  %v3195_v50 = vld [vmem:[#allocation22_spill] sm:$0xff] }
 0x11c   :  { %441 = vmatpush1.msra.mxu0 %v1779_v1  ;;  %512 = vmatpush1.msra.mxu1 %v1833_v11 }
 0x11d   :  { %442 = vmatprep.subr.mxu0 %v1784_v2  ;;  %513 = vmatprep.subr.mxu1 %v1845_v13 }
 0x11e   :  { %443 = vmatpush1.msra.mxu0 %v1792_v4  ;;  %514 = vmatpush1.msra.mxu1 %v1850_v14 }
 0x11f   :  { %444 = vmatprep.subr.mxu0 %v1798_v5  ;;  %515 = vmatprep.subr.mxu1 %v1862_v16 }
 0x120   :  { %445 = vmatpush1.msra.mxu0 %v1804_v6  ;;  %516 = vmatpush1.msra.mxu1 %v1874_v18 }
 0x121   :  { %446 = vmatprep.subr.mxu0 %v1810_v7  ;;  %517 = vmatprep.subr.mxu1 %v1879_v19 }
 0x122   :  { %447 = vmatpush1.msra.mxu0 %v1816_v8  ;;  %518 = vmatpush1.msra.mxu1 %v1891_v21 }
 0x123   :  { %448 = vmatprep.subr.mxu0 %v1827_v10  ;;  %519 = vmatprep.subr.mxu1 %v1903_v23 }
 0x124   :  { %449 = vmatpush1.msra.mxu0 %v1839_v12  ;;  %520 = vmatpush1.msra.mxu1 %v1915_v25 }
 0x125   :  { %450 = vmatprep.subr.mxu0 %v1856_v15  ;;  %521 = vmatprep.subr.mxu1 %v1927_v27 }
 0x126   :  { %451 = vmatpush1.msra.mxu0 %v1868_v17  ;;  %522 = vmatpush1.msra.mxu1 %v1939_v29 }
 0x127   :  { %452 = vmatprep.subr.mxu0 %v1885_v20  ;;  %523 = vmatprep.subr.mxu1 %v1951_v31 }
 0x128   :  { %453 = vmatpush1.msra.mxu0 %v1897_v22  ;;  %524 = vmatpush1.msra.mxu1 %v1963_v33 }
 0x129   :  { %454 = vmatprep.subr.mxu0 %v1909_v24  ;;  %525 = vmatprep.subr.mxu1 %v1975_v35 }
 0x12a   :  { %455 = vmatpush1.msra.mxu0 %v1921_v26  ;;  %526 = vmatpush1.msra.mxu1 %v1987_v37 }
 0x12b   :  { %456 = vmatprep.subr.mxu0 %v1933_v28  ;;  %527 = vmatprep.subr.mxu1 %v1999_v39 }
 0x12c   :  { %457 = vmatpush1.msra.mxu0 %v1945_v30  ;;  %528 = vmatpush1.msra.mxu1 %v2011_v41 }
 0x12d   :  { %458 = vmatprep.subr.mxu0 %v1957_v32  ;;  %529 = vmatprep.subr.mxu1 %v2023_v43 }
 0x12e   :  { %459 = vmatpush1.msra.mxu0 %v1969_v34  ;;  %530 = vmatpush1.msra.mxu1 %v2035_v45 }
 0x12f   :  { %460 = vmatprep.subr.mxu0 %v1981_v36  ;;  %531 = vmatprep.subr.mxu1 %v2047_v47 }
 0x130   :  { %461 = vmatpush1.msra.mxu0 %v1993_v38  ;;  %532 = vmatpush1.msra.mxu1 %v2059_v49 }
 0x131   :  { %462 = vmatprep.subr.mxu0 %v2005_v40  ;;  %533 = vmatprep.subr.mxu1 %v2071_v51 }
 0x132   :  { %463 = vmatpush1.msra.mxu0 %v2017_v42  ;;  %534 = vmatpush1.msra.mxu1 %v3178_v44 }
 0x133   :  { %464 = vmatprep.subr.mxu0 %v3179_v46  ;;  %535 = vmatprep.subr.mxu1 %v3180_v55 }
 0x134   :  { %465 = vmatpush1.msra.mxu0 %v3181_v57  ;;  %536 = vmatpush1.msra.mxu1 %v3182_v58 }
 0x135   :  { %466 = vmatprep.subr.mxu0 %v3183_v59  ;;  %537 = vmatprep.subr.mxu1 %v3184_v60  ;;  %v1508_v59 = vld [vmem:[%s3086_s0 + $0x30] sm:$0xff] }
 0x136   :  { %467 = vmatpush1.msra.mxu0 %v3185_v54  ;;  %538 = vmatpush1.msra.mxu1 %v3186_v56  ;;  %v3196_v56 = vld [vmem:[#allocation4_spill] sm:$0xff] }
 0x137   :  { %468 = vmatprep.subr.mxu0 %v3187_v3  ;;  %539 = vmatprep.subr.mxu1 %v3188_v52  ;;  %v3197_v3 = vld [vmem:[#allocation5_spill] sm:$0xff] }
 0x138   :  { %469 = vmatpush1.msra.mxu0 %v3189_v48  ;;  %540 = vmatpush1.msra.mxu1 %v3190_v61  ;;  %v1506_v61 = vld [vmem:[%s3086_s0 + $0x20] sm:$0xff] }
 0x139   :  { %470 = vmatprep.subr.mxu0 %v3191_v62  ;;  %541 = vmatprep.subr.mxu1 %v3192_v63  ;;  %v1507_v63 = vld [vmem:[%s3086_s0 + $0x28] sm:$0xff] }
 0x13a   :  { %471 = vmatpush1.msra.mxu0 %v3193_v0  ;;  %504 = vmatprep.mubr.f32.mxu0 %v3194_v9 }
 0x13b   :  { %542 = vmatpush1.msra.mxu1 %v3195_v50  ;;  %575 = vmatprep.mubr.f32.mxu1 %v3194_v9 }
 0x13c   :  { %617 = vmatprep.subr.mxu0 %v3196_v56  ;;  %688 = vmatprep.subr.mxu1 %v3197_v3  ;;  %v1509_v3 = vld [vmem:[%s3086_s0 + $0x38] sm:$0xff] }
 0x1db   :  { %v329_v48 = vpop.f32.mrf.mxu0  ;;  %v400_v50 = vpop.f32.mrf.mxu1 }
 0x1dc   :  { %v405_v0 = vadd.f32 %v1506_v61, %v329_v48  ;;  %v407_v48 = vadd.f32 %v1508_v59, %v400_v50  ;;  %v3201_v50 = vld [vmem:[#allocation15_spill] sm:$0xff] }
 0x1dd   :  { %v331_v62 = vpop.f32.mrf.mxu0  ;;  %v402_v56 = vpop.f32.mrf.mxu1 }
 0x1de   :  { %v1510_v52 = vmul.f32 -1.442695, %v405_v0  ;;  %v406_v54 = vadd.f32 %v1507_v63, %v331_v62  ;;  %v408_v60 = vadd.f32 %v1509_v3, %v402_v56 }
 0x1e0   :  { %1579 = vpow2.f32 %v1510_v52  ;;  %v1511_v9 = vmul.f32 -1.442695, %v406_v54  ;;  %v1512_v58 = vmul.f32 -1.442695, %v408_v60  ;;  %v3200_v60 = vld [vmem:[#allocation7_spill] sm:$0xff] }
 0x1e2   :  { %1581 = vpow2.f32 %v1511_v9 }
 0x1e3   :  { %1583 = vpow2.f32 %v1512_v58 }
 0x1ed   :  { %v1580_v57 = vpop.eup %1579 }
 0x1ee   :  { %v412_v61 = vadd.f32 1.0, %v1580_v57 }
 0x1ef   :  { %v1582_v0 = vpop.eup %1581 }
 0x1f0   :  { %1585 = vrcp.f32 %v412_v61  ;;  %v418_v52 = vadd.f32 1.0, %v1582_v0  ;;  %v1584_v54 = vpop.eup %1583  ;;  %v3203_v61 = vld [vmem:[#allocation17_spill] sm:$0xff] }
 0x1f1   :  { %1587 = vtanh.f32 %v407_v48  ;;  %v425_v55 = vadd.f32 1.0, %v1584_v54  ;;  %v3202_v48 = vld [vmem:[#allocation8_spill] sm:$0xff]  ;;  %v3204_v0 = vld [vmem:[#allocation9_spill] sm:$0xff]  ;;  %v3206_v54 = vld [vmem:[#allocation10_spill] sm:$0xff] }
 0x1f2   :  { %1589 = vrcp.f32 %v418_v52  ;;  %v3205_v52 = vld [vmem:[#allocation18_spill] sm:$0xff] }
 0x1f3   :  { %1591 = vrcp.f32 %v425_v55  ;;  %v3199_v55 = vld [vmem:[#allocation13_spill] sm:$0xff] }
 0x1fd   :  { %v1586_v62 = vpop.eup %1585 }
 0x1fe   :  { %v1588_v63 = vpop.eup %1587 }
 0x1ff   :  { %v1590_v9 = vpop.eup %1589  ;;  %v429_v56 = vmul.f32 %v1588_v63, %v1586_v62  ;;  %v3207_v62 = vld [vmem:[#allocation19_spill] sm:$0xff]  ;;  %v3208_v63 = vld [vmem:[#allocation12_spill] sm:$0xff] }
 0x200   :  { %v428_v3 = vmul.f32 %v1590_v9, %v2239_v53  ;;  %v1592_v57 = vpop.eup %1591  ;;  %v3198_v53 = vld [vmem:[#allocation6_spill] sm:$0xff]  ;;  %v3209_v9 = vld [vmem:[#allocation20_spill] sm:$0xff] }
 0x202   :  { %v2324_v46 = vadd.f32 %v429_v56, %v428_v3  ;;  %v3210_v56 = vld [vmem:[#allocation14_spill] sm:$0xff]  ;;  %v3211_v3 = vld [vmem:[#allocation21_spill] sm:$0xff] }
 0x204   :  { %1593 = vtanh.f32 %v2324_v46 }
 0x211   :  { %v1594_v59 = vpop.eup %1593 }
 0x212   :  { %v432_v58 = vmul.f32 %v1594_v59, %v1592_v57  ;;  %v3212_v57 = vld [vmem:[#allocation16_spill] sm:$0xff]  ;;  %v3213_v59 = vmov 0.0  }
 0x214   :  { %1513 = vst [vmem:[%s3087_s2 + $0x8] sm:$0xff] %v432_v58  ;;  %505 = vmatmul.mubr.f32.vlgmr.msra.gmra.mxu0 %v432_v58  ;;  %576 = vmatmul.mubr.f32.vlgmr.msra.gmra.mxu1 %v432_v58  ;;  %v3214_v58 = vld [vmem:[#allocation22_spill] sm:$0xff] }
 0x215   :  { %618 = vmatpush1.msra.mxu0 %v1779_v1  ;;  %689 = vmatpush1.msra.mxu1 %v1833_v11 }
 0x216   :  { %619 = vmatprep.subr.mxu0 %v1784_v2  ;;  %690 = vmatprep.subr.mxu1 %v1845_v13 }
 0x217   :  { %620 = vmatpush1.msra.mxu0 %v1792_v4  ;;  %691 = vmatpush1.msra.mxu1 %v1850_v14 }
 0x218   :  { %621 = vmatprep.subr.mxu0 %v1798_v5  ;;  %692 = vmatprep.subr.mxu1 %v1862_v16 }
 0x219   :  { %622 = vmatpush1.msra.mxu0 %v1804_v6  ;;  %693 = vmatpush1.msra.mxu1 %v1874_v18 }
 0x21a   :  { %623 = vmatprep.subr.mxu0 %v1810_v7  ;;  %694 = vmatprep.subr.mxu1 %v1879_v19 }
 0x21b   :  { %624 = vmatpush1.msra.mxu0 %v1816_v8  ;;  %695 = vmatpush1.msra.mxu1 %v1891_v21 }
 0x21c   :  { %625 = vmatprep.subr.mxu0 %v1827_v10  ;;  %696 = vmatprep.subr.mxu1 %v1903_v23 }
 0x21d   :  { %626 = vmatpush1.msra.mxu0 %v1839_v12  ;;  %697 = vmatpush1.msra.mxu1 %v1915_v25 }
 0x21e   :  { %627 = vmatprep.subr.mxu0 %v1856_v15  ;;  %698 = vmatprep.subr.mxu1 %v1927_v27 }
 0x21f   :  { %628 = vmatpush1.msra.mxu0 %v1868_v17  ;;  %699 = vmatpush1.msra.mxu1 %v1939_v29 }
 0x220   :  { %629 = vmatprep.subr.mxu0 %v1885_v20  ;;  %700 = vmatprep.subr.mxu1 %v1951_v31 }
 0x221   :  { %630 = vmatpush1.msra.mxu0 %v1897_v22  ;;  %701 = vmatpush1.msra.mxu1 %v1963_v33 }
 0x222   :  { %631 = vmatprep.subr.mxu0 %v1909_v24  ;;  %702 = vmatprep.subr.mxu1 %v1975_v35 }
 0x223   :  { %632 = vmatpush1.msra.mxu0 %v1921_v26  ;;  %703 = vmatpush1.msra.mxu1 %v1987_v37 }
 0x224   :  { %633 = vmatprep.subr.mxu0 %v1933_v28  ;;  %704 = vmatprep.subr.mxu1 %v1999_v39 }
 0x225   :  { %634 = vmatpush1.msra.mxu0 %v1945_v30  ;;  %705 = vmatpush1.msra.mxu1 %v2011_v41 }
 0x226   :  { %635 = vmatprep.subr.mxu0 %v1957_v32  ;;  %706 = vmatprep.subr.mxu1 %v2023_v43 }
 0x227   :  { %636 = vmatpush1.msra.mxu0 %v1969_v34  ;;  %707 = vmatpush1.msra.mxu1 %v2035_v45 }
 0x228   :  { %637 = vmatprep.subr.mxu0 %v1981_v36  ;;  %708 = vmatprep.subr.mxu1 %v2047_v47 }
 0x229   :  { %638 = vmatpush1.msra.mxu0 %v1993_v38  ;;  %709 = vmatpush1.msra.mxu1 %v2059_v49 }
 0x22a   :  { %639 = vmatprep.subr.mxu0 %v2005_v40  ;;  %710 = vmatprep.subr.mxu1 %v2071_v51 }
 0x22b   :  { %640 = vmatpush1.msra.mxu0 %v2017_v42  ;;  %711 = vmatpush1.msra.mxu1 %v3178_v44 }
 0x22c   :  { %641 = vmatprep.subr.mxu0 %v3198_v53  ;;  %712 = vmatprep.subr.mxu1 %v3199_v55 }
 0x22d   :  { %642 = vmatpush1.msra.mxu0 %v3200_v60  ;;  %713 = vmatpush1.msra.mxu1 %v3201_v50 }
 0x22e   :  { %643 = vmatprep.subr.mxu0 %v3202_v48  ;;  %714 = vmatprep.subr.mxu1 %v3203_v61  ;;  %v1516_v48 = vld [vmem:[%s3086_s0 + $0x50] sm:$0xff] }
 0x22f   :  { %644 = vmatpush1.msra.mxu0 %v3204_v0  ;;  %715 = vmatpush1.msra.mxu1 %v3205_v52  ;;  %v3215_v52 = vld [vmem:[#allocation4_spill] sm:$0xff] }
 0x230   :  { %645 = vmatprep.subr.mxu0 %v3206_v54  ;;  %716 = vmatprep.subr.mxu1 %v3207_v62  ;;  %v3216_v54 = vld [vmem:[#allocation5_spill] sm:$0xff] }
 0x231   :  { %646 = vmatpush1.msra.mxu0 %v3208_v63  ;;  %717 = vmatpush1.msra.mxu1 %v3209_v9  ;;  %v1514_v9 = vld [vmem:[%s3086_s0 + $0x40] sm:$0xff] }
 0x232   :  { %647 = vmatprep.subr.mxu0 %v3210_v56  ;;  %718 = vmatprep.subr.mxu1 %v3211_v3  ;;  %v1515_v3 = vld [vmem:[%s3086_s0 + $0x48] sm:$0xff] }
 0x233   :  { %648 = vmatpush1.msra.mxu0 %v3212_v57  ;;  %681 = vmatprep.mubr.f32.mxu0 %v3213_v59 }
 0x234   :  { %719 = vmatpush1.msra.mxu1 %v3214_v58  ;;  %752 = vmatprep.mubr.f32.mxu1 %v3213_v59 }
 0x235   :  { %794 = vmatprep.subr.mxu0 %v3215_v52  ;;  %865 = vmatprep.subr.mxu1 %v3216_v54  ;;  %v1517_v52 = vld [vmem:[%s3086_s0 + $0x58] sm:$0xff] }
 0x2d4   :  { %v506_v63 = vpop.f32.mrf.mxu0  ;;  %v577_v58 = vpop.f32.mrf.mxu1 }
 0x2d5   :  { %v582_v57 = vadd.f32 %v1514_v9, %v506_v63  ;;  %v584_v63 = vadd.f32 %v1516_v48, %v577_v58 }
 0x2d6   :  { %v508_v56 = vpop.f32.mrf.mxu0  ;;  %v579_v54 = vpop.f32.mrf.mxu1 }
 0x2d7   :  { %v1518_v62 = vmul.f32 -1.442695, %v582_v57  ;;  %v583_v0 = vadd.f32 %v1515_v3, %v508_v56  ;;  %v585_v61 = vadd.f32 %v1517_v52, %v579_v54 }
 0x2d9   :  { %1595 = vpow2.f32 %v1518_v62  ;;  %v1519_v59 = vmul.f32 -1.442695, %v583_v0  ;;  %v1520_v50 = vmul.f32 -1.442695, %v585_v61 }
 0x2db   :  { %1597 = vpow2.f32 %v1519_v59 }
 0x2dc   :  { %1599 = vpow2.f32 %v1520_v50 }
 0x2e6   :  { %v1596_v60 = vpop.eup %1595 }
 0x2e7   :  { %v589_v9 = vadd.f32 1.0, %v1596_v60 }
 0x2e8   :  { %v1598_v57 = vpop.eup %1597 }
 0x2e9   :  { %1601 = vrcp.f32 %v589_v9  ;;  %v595_v62 = vadd.f32 1.0, %v1598_v57  ;;  %v1600_v0 = vpop.eup %1599  ;;  %v2508_v9 = vld [vmem:[%s3085_s1 + $0x1e0] sm:$0xff]  ;;  %v2520_v57 = vld [vmem:[%s3085_s1 + $0x1c8] sm:$0xff] }
 0x2ea   :  { %1603 = vtanh.f32 %v584_v63  ;;  %v602_v55 = vadd.f32 1.0, %v1600_v0  ;;  %v2532_v0 = vld [vmem:[%s3085_s1 + $0x1c0] sm:$0xff] }
 0x2eb   :  { %1605 = vrcp.f32 %v595_v62  ;;  %v2526_v62 = vld [vmem:[%s3085_s1 + $0x1d8] sm:$0xff] }
 0x2ec   :  { %1607 = vrcp.f32 %v602_v55 }
 0x2f6   :  { %v1602_v56 = vpop.eup %1601 }
 0x2f7   :  { %v1604_v3 = vpop.eup %1603 }
 0x2f8   :  { %v1606_v59 = vpop.eup %1605  ;;  %v606_v54 = vmul.f32 %v1604_v3, %v1602_v56  ;;  %v2538_v56 = vld [vmem:[%s3085_s1 + $0x1d0] sm:$0xff]  ;;  %v2544_v3 = vld [vmem:[%s3085_s1 + $0x1a8] sm:$0xff] }
 0x2f9   :  { %v605_v52 = vmul.f32 %v1606_v59, %v2324_v46  ;;  %v1608_v60 = vpop.eup %1607  ;;  %v2550_v59 = vld [vmem:[%s3085_s1 + $0x1b8] sm:$0xff] }
 0x2fb   :  { %v2409_v53 = vadd.f32 %v606_v54, %v605_v52  ;;  %v2556_v54 = vld [vmem:[%s3085_s1 + $0x1a0] sm:$0xff]  ;;  %v2562_v52 = vld [vmem:[%s3085_s1 + $0x1b0] sm:$0xff] }
 0x2fd   :  { %1609 = vtanh.f32 %v2409_v53 }
 0x30a   :  { %v1610_v48 = vpop.eup %1609 }
 0x30b   :  { %v609_v50 = vmul.f32 %v1610_v48, %v1608_v60  ;;  %v2568_v60 = vld [vmem:[%s3085_s1 + $0x188] sm:$0xff]  ;;  %v2574_v48 = vld [vmem:[%s3085_s1 + $0x198] sm:$0xff] }
 0x30d   :  { %1521 = vst [vmem:[%s3087_s2 + $0x10] sm:$0xff] %v609_v50  ;;  %682 = vmatmul.mubr.f32.vlgmr.msra.gmra.mxu0 %v609_v50  ;;  %753 = vmatmul.mubr.f32.vlgmr.msra.gmra.mxu1 %v609_v50  ;;  %v2580_v50 = vld [vmem:[%s3085_s1 + $0x180] sm:$0xff] }
 0x30e   :  { %795 = vmatpush1.msra.mxu0 %v1779_v1  ;;  %866 = vmatpush1.msra.mxu1 %v1833_v11  ;;  %v3217_v1 = vld [vmem:[#allocation6_spill] sm:$0xff] }
 0x30f   :  { %796 = vmatprep.subr.mxu0 %v1784_v2  ;;  %867 = vmatprep.subr.mxu1 %v1845_v13  ;;  %v3218_v2 = vld [vmem:[#allocation13_spill] sm:$0xff]  ;;  %v3225_v11 = vld [vmem:[#allocation10_spill] sm:$0xff]  ;;  %v3227_v13 = vld [vmem:[#allocation12_spill] sm:$0xff] }
 0x310   :  { %797 = vmatpush1.msra.mxu0 %v1792_v4  ;;  %868 = vmatpush1.msra.mxu1 %v1850_v14  ;;  %v3219_v4 = vld [vmem:[#allocation7_spill] sm:$0xff]  ;;  %v3228_v14 = vld [vmem:[#allocation20_spill] sm:$0xff] }
 0x311   :  { %798 = vmatprep.subr.mxu0 %v1798_v5  ;;  %869 = vmatprep.subr.mxu1 %v1862_v16  ;;  %v3220_v5 = vld [vmem:[#allocation15_spill] sm:$0xff]  ;;  %v3230_v16 = vld [vmem:[#allocation21_spill] sm:$0xff] }
 0x312   :  { %799 = vmatpush1.msra.mxu0 %v1804_v6  ;;  %870 = vmatpush1.msra.mxu1 %v1874_v18  ;;  %v3221_v6 = vld [vmem:[#allocation8_spill] sm:$0xff]  ;;  %v3232_v18 = vmov 0.0  }
 0x313   :  { %800 = vmatprep.subr.mxu0 %v1810_v7  ;;  %871 = vmatprep.subr.mxu1 %v1879_v19  ;;  %v3222_v7 = vld [vmem:[#allocation17_spill] sm:$0xff]  ;;  %v3233_v19 = vld [vmem:[#allocation22_spill] sm:$0xff] }
 0x314   :  { %801 = vmatpush1.msra.mxu0 %v1816_v8  ;;  %872 = vmatpush1.msra.mxu1 %v1891_v21  ;;  %v3223_v8 = vld [vmem:[#allocation9_spill] sm:$0xff] }
 0x315   :  { %802 = vmatprep.subr.mxu0 %v1827_v10  ;;  %873 = vmatprep.subr.mxu1 %v1903_v23  ;;  %v3224_v10 = vld [vmem:[#allocation18_spill] sm:$0xff]  ;;  %v3235_v21 = vld [vmem:[#allocation5_spill] sm:$0xff] }
 0x316   :  { %803 = vmatpush1.msra.mxu0 %v1839_v12  ;;  %874 = vmatpush1.msra.mxu1 %v1915_v25  ;;  %v3226_v12 = vld [vmem:[#allocation19_spill] sm:$0xff] }
 0x317   :  { %804 = vmatprep.subr.mxu0 %v1856_v15  ;;  %875 = vmatprep.subr.mxu1 %v1927_v27  ;;  %v3229_v15 = vld [vmem:[#allocation14_spill] sm:$0xff] }
 0x318   :  { %805 = vmatpush1.msra.mxu0 %v1868_v17  ;;  %876 = vmatpush1.msra.mxu1 %v1939_v29  ;;  %v3231_v17 = vld [vmem:[#allocation16_spill] sm:$0xff] }
 0x319   :  { %806 = vmatprep.subr.mxu0 %v1885_v20  ;;  %877 = vmatprep.subr.mxu1 %v1951_v31  ;;  %v2482_v20 = vld [vmem:[%s3085_s1 + $0x1e8] sm:$0xff]  ;;  %v1525_v31 = vld [vmem:[%s3086_s0 + $0x78] sm:$0xff] }
 0x31a   :  { %807 = vmatpush1.msra.mxu0 %v1897_v22  ;;  %878 = vmatpush1.msra.mxu1 %v1963_v33  ;;  %3234 = vst [vmem:[#allocation11_spill] sm:$0xff] %v2482_v20  ;;  %v1522_v22 = vld [vmem:[%s3086_s0 + $0x60] sm:$0xff] }
 0x31b   :  { %808 = vmatprep.subr.mxu0 %v1909_v24  ;;  %879 = vmatprep.subr.mxu1 %v1975_v35  ;;  %v1523_v24 = vld [vmem:[%s3086_s0 + $0x68] sm:$0xff] }
 0x31c   :  { %809 = vmatpush1.msra.mxu0 %v1921_v26  ;;  %880 = vmatpush1.msra.mxu1 %v1987_v37 }
 0x31d   :  { %810 = vmatprep.subr.mxu0 %v1933_v28  ;;  %881 = vmatprep.subr.mxu1 %v1999_v39 }
 0x31e   :  { %811 = vmatpush1.msra.mxu0 %v1945_v30  ;;  %882 = vmatpush1.msra.mxu1 %v2011_v41 }
 0x31f   :  { %812 = vmatprep.subr.mxu0 %v1957_v32  ;;  %883 = vmatprep.subr.mxu1 %v2023_v43 }
 0x320   :  { %813 = vmatpush1.msra.mxu0 %v1969_v34  ;;  %884 = vmatpush1.msra.mxu1 %v2035_v45  ;;  %v1524_v34 = vld [vmem:[%s3086_s0 + $0x70] sm:$0xff] }
 0x321   :  { %814 = vmatprep.subr.mxu0 %v1981_v36  ;;  %885 = vmatprep.subr.mxu1 %v2047_v47 }
 0x322   :  { %815 = vmatpush1.msra.mxu0 %v1993_v38  ;;  %886 = vmatpush1.msra.mxu1 %v2059_v49 }
 0x323   :  { %816 = vmatprep.subr.mxu0 %v2005_v40  ;;  %887 = vmatprep.subr.mxu1 %v2071_v51 }
 0x324   :  { %817 = vmatpush1.msra.mxu0 %v2017_v42  ;;  %888 = vmatpush1.msra.mxu1 %v3178_v44 }
 0x325   :  { %818 = vmatprep.subr.mxu0 %v3217_v1  ;;  %889 = vmatprep.subr.mxu1 %v3218_v2  ;;  %v2586_v1 = vld [vmem:[%s3085_s1 + $0x190] sm:$0xff] }
 0x326   :  { %819 = vmatpush1.msra.mxu0 %v3219_v4  ;;  %890 = vmatpush1.msra.mxu1 %v3220_v5  ;;  %v2592_v4 = vld [vmem:[%s3085_s1 + $0x168] sm:$0xff] }
 0x327   :  { %820 = vmatprep.subr.mxu0 %v3221_v6  ;;  %891 = vmatprep.subr.mxu1 %v3222_v7  ;;  %v2598_v6 = vld [vmem:[%s3085_s1 + $0x178] sm:$0xff] }
 0x328   :  { %821 = vmatpush1.msra.mxu0 %v3223_v8  ;;  %892 = vmatpush1.msra.mxu1 %v3224_v10  ;;  %v2604_v8 = vld [vmem:[%s3085_s1 + $0x160] sm:$0xff] }
 0x329   :  { %822 = vmatprep.subr.mxu0 %v3225_v11  ;;  %893 = vmatprep.subr.mxu1 %v3226_v12  ;;  %v2610_v11 = vld [vmem:[%s3085_s1 + $0x170] sm:$0xff] }
 0x32a   :  { %823 = vmatpush1.msra.mxu0 %v3227_v13  ;;  %894 = vmatpush1.msra.mxu1 %v3228_v14  ;;  %v2616_v13 = vld [vmem:[%s3085_s1 + $0x148] sm:$0xff] }
 0x32b   :  { %824 = vmatprep.subr.mxu0 %v3229_v15  ;;  %895 = vmatprep.subr.mxu1 %v3230_v16  ;;  %v2622_v15 = vld [vmem:[%s3085_s1 + $0x158] sm:$0xff] }
 0x32c   :  { %825 = vmatpush1.msra.mxu0 %v3231_v17  ;;  %858 = vmatprep.mubr.f32.mxu0 %v3232_v18  ;;  %v2628_v17 = vld [vmem:[%s3085_s1 + $0x140] sm:$0xff] }
 0x32d   :  { %896 = vmatpush1.msra.mxu1 %v3233_v19  ;;  %929 = vmatprep.mubr.f32.mxu1 %v3232_v18 }
 0x32e   :  { %971 = vmatprep.subr.mxu0 %v2482_v20  ;;  %1042 = vmatprep.subr.mxu1 %v3235_v21  ;;  %v2634_v21 = vld [vmem:[%s3085_s1 + $0x150] sm:$0xff] }
 0x3cd   :  { %v683_v23 = vpop.f32.mrf.mxu0  ;;  %v754_v29 = vpop.f32.mrf.mxu1 }
 0x3ce   :  { %v759_v25 = vadd.f32 %v1522_v22, %v683_v23  ;;  %v761_v37 = vadd.f32 %v1524_v34, %v754_v29  ;;  %v2640_v22 = vld [vmem:[%s3085_s1 + $0x128] sm:$0xff]  ;;  %v2646_v23 = vld [vmem:[%s3085_s1 + $0x138] sm:$0xff]  ;;  %v2682_v29 = vld [vmem:[%s3085_s1 + $0x110] sm:$0xff] }
 0x3cf   :  { %v685_v26 = vpop.f32.mrf.mxu0  ;;  %v756_v32 = vpop.f32.mrf.mxu1  ;;  %v2712_v34 = vld [vmem:[%s3085_s1 + $0xc8] sm:$0xff] }
 0x3d0   :  { %v1526_v27 = vmul.f32 -1.442695, %v759_v25  ;;  %v760_v28 = vadd.f32 %v1523_v24, %v685_v26  ;;  %v762_v33 = vadd.f32 %v1525_v31, %v756_v32  ;;  %v2652_v24 = vld [vmem:[%s3085_s1 + $0x120] sm:$0xff]  ;;  %v2658_v25 = vld [vmem:[%s3085_s1 + $0x130] sm:$0xff]  ;;  %v2664_v26 = vld [vmem:[%s3085_s1 + $0x108] sm:$0xff] }
 0x3d1   :  { %v2694_v31 = vld [vmem:[%s3085_s1 + $0xf8] sm:$0xff]  ;;  %v2700_v32 = vld [vmem:[%s3085_s1 + $0xe0] sm:$0xff] }
 0x3d2   :  { %1611 = vpow2.f32 %v1526_v27  ;;  %v1527_v30 = vmul.f32 -1.442695, %v760_v28  ;;  %v1528_v35 = vmul.f32 -1.442695, %v762_v33  ;;  %v2670_v27 = vld [vmem:[%s3085_s1 + $0x118] sm:$0xff]  ;;  %v2676_v28 = vld [vmem:[%s3085_s1 + $0x100] sm:$0xff] }
 0x3d3   :  { %v2706_v33 = vld [vmem:[%s3085_s1 + $0xf0] sm:$0xff] }
 0x3d4   :  { %1613 = vpow2.f32 %v1527_v30  ;;  %v2688_v30 = vld [vmem:[%s3085_s1 + $0xe8] sm:$0xff] }
 0x3d5   :  { %1615 = vpow2.f32 %v1528_v35  ;;  %v2718_v35 = vld [vmem:[%s3085_s1 + $0xd8] sm:$0xff] }
 0x3df   :  { %v1612_v36 = vpop.eup %1611 }
 0x3e0   :  { %v766_v38 = vadd.f32 1.0, %v1612_v36  ;;  %v2724_v36 = vld [vmem:[%s3085_s1 + $0xc0] sm:$0xff] }
 0x3e1   :  { %v1614_v39 = vpop.eup %1613 }
 0x3e2   :  { %1617 = vrcp.f32 %v766_v38  ;;  %v772_v40 = vadd.f32 1.0, %v1614_v39  ;;  %v1616_v41 = vpop.eup %1615  ;;  %v2736_v38 = vld [vmem:[%s3085_s1 + $0xa8] sm:$0xff]  ;;  %v2742_v39 = vld [vmem:[%s3085_s1 + $0xb8] sm:$0xff] }
 0x3e3   :  { %1619 = vtanh.f32 %v761_v37  ;;  %v779_v47 = vadd.f32 1.0, %v1616_v41  ;;  %v2730_v37 = vld [vmem:[%s3085_s1 + $0xd0] sm:$0xff] }
 0x3e4   :  { %1621 = vrcp.f32 %v772_v40  ;;  %v2748_v40 = vld [vmem:[%s3085_s1 + $0xa0] sm:$0xff]  ;;  %v2754_v41 = vld [vmem:[%s3085_s1 + $0xb0] sm:$0xff] }
 0x3e5   :  { %1623 = vrcp.f32 %v779_v47 }
 0x3ef   :  { %v1618_v42 = vpop.eup %1617 }
 0x3f0   :  { %v1620_v43 = vpop.eup %1619 }
 0x3f1   :  { %v1622_v45 = vpop.eup %1621  ;;  %v783_v49 = vmul.f32 %v1620_v43, %v1618_v42  ;;  %v2760_v42 = vld [vmem:[%s3085_s1 + $0x88] sm:$0xff]  ;;  %v2767_v43 = vld [vmem:[%s3085_s1 + $0x80] sm:$0xff] }
 0x3f2   :  { %v782_v46 = vmul.f32 %v1622_v45, %v2409_v53  ;;  %v1624_v61 = vpop.eup %1623  ;;  %v2514_v53 = vld [vmem:[%s3085_s1 + $0x1f0] sm:$0xff]  ;;  %v2774_v45 = vld [vmem:[%s3085_s1 + $0x68] sm:$0xff] }
 0x3f3   :  { %3236 = vst [vmem:[#allocation4_spill] sm:$0xff] %v2774_v45 }
 0x3f4   :  { %v2499_v55 = vadd.f32 %v783_v49, %v782_v46 }
 0x3f6   :  { %1625 = vtanh.f32 %v2499_v55 }
 0x403   :  { %v1626_v58 = vpop.eup %1625 }
 0x404   :  { %v786_v63 = vmul.f32 %v1626_v58, %v1624_v61 }
 0x406   :  { %1529 = vst [vmem:[%s3087_s2 + $0x18] sm:$0xff] %v786_v63  ;;  %859 = vmatmul.mubr.f32.vlgmr.msra.gmra.mxu0 %v786_v63  ;;  %930 = vmatmul.mubr.f32.vlgmr.msra.gmra.mxu1 %v786_v63 }
 0x407   :  { %972 = vmatpush1.msra.mxu0 %v2508_v9  ;;  %1043 = vmatpush1.msra.mxu1 %v2514_v53 }
 0x408   :  { %973 = vmatprep.subr.mxu0 %v2520_v57  ;;  %1044 = vmatprep.subr.mxu1 %v2526_v62 }
 0x409   :  { %974 = vmatpush1.msra.mxu0 %v2532_v0  ;;  %1045 = vmatpush1.msra.mxu1 %v2538_v56 }
 0x40a   :  { %975 = vmatprep.subr.mxu0 %v2544_v3  ;;  %1046 = vmatprep.subr.mxu1 %v2550_v59 }
 0x40b   :  { %976 = vmatpush1.msra.mxu0 %v2556_v54  ;;  %1047 = vmatpush1.msra.mxu1 %v2562_v52 }
 0x40c   :  { %977 = vmatprep.subr.mxu0 %v2568_v60  ;;  %1048 = vmatprep.subr.mxu1 %v2574_v48 }
 0x40d   :  { %978 = vmatpush1.msra.mxu0 %v2580_v50  ;;  %1049 = vmatpush1.msra.mxu1 %v2586_v1 }
 0x40e   :  { %979 = vmatprep.subr.mxu0 %v2592_v4  ;;  %1050 = vmatprep.subr.mxu1 %v2598_v6 }
 0x40f   :  { %980 = vmatpush1.msra.mxu0 %v2604_v8  ;;  %1051 = vmatpush1.msra.mxu1 %v2610_v11 }
 0x410   :  { %981 = vmatprep.subr.mxu0 %v2616_v13  ;;  %1052 = vmatprep.subr.mxu1 %v2622_v15 }
 0x411   :  { %982 = vmatpush1.msra.mxu0 %v2628_v17  ;;  %1053 = vmatpush1.msra.mxu1 %v2634_v21 }
 0x412   :  { %983 = vmatprep.subr.mxu0 %v2640_v22  ;;  %1054 = vmatprep.subr.mxu1 %v2646_v23 }
 0x413   :  { %984 = vmatpush1.msra.mxu0 %v2652_v24  ;;  %1055 = vmatpush1.msra.mxu1 %v2658_v25 }
 0x414   :  { %985 = vmatprep.subr.mxu0 %v2664_v26  ;;  %1056 = vmatprep.subr.mxu1 %v2670_v27 }
 0x415   :  { %986 = vmatpush1.msra.mxu0 %v2676_v28  ;;  %1057 = vmatpush1.msra.mxu1 %v2682_v29 }
 0x416   :  { %987 = vmatprep.subr.mxu0 %v2688_v30  ;;  %1058 = vmatprep.subr.mxu1 %v2694_v31 }
 0x417   :  { %988 = vmatpush1.msra.mxu0 %v2700_v32  ;;  %1059 = vmatpush1.msra.mxu1 %v2706_v33 }
 0x418   :  { %989 = vmatprep.subr.mxu0 %v2712_v34  ;;  %1060 = vmatprep.subr.mxu1 %v2718_v35 }
 0x419   :  { %990 = vmatpush1.msra.mxu0 %v2724_v36  ;;  %1061 = vmatpush1.msra.mxu1 %v2730_v37 }
 0x41a   :  { %991 = vmatprep.subr.mxu0 %v2736_v38  ;;  %1062 = vmatprep.subr.mxu1 %v2742_v39 }
 0x41b   :  { %992 = vmatpush1.msra.mxu0 %v2748_v40  ;;  %1063 = vmatpush1.msra.mxu1 %v2754_v41 }
 0x41c   :  { %993 = vmatprep.subr.mxu0 %v2760_v42  ;;  %1064 = vmatprep.subr.mxu1 %v2071_v51  ;;  %v2781_v51 = vld [vmem:[%s3085_s1 + $0x60] sm:$0xff] }
 0x41d   :  { %994 = vmatpush1.msra.mxu0 %v2767_v43  ;;  %1065 = vmatpush1.msra.mxu1 %v3178_v44  ;;  %3237 = vst [vmem:[#allocation6_spill] sm:$0xff] %v2781_v51  ;;  %v2788_v44 = vld [vmem:[%s3085_s1 + $0x48] sm:$0xff] }
 0x41e   :  { %995 = vmatprep.subr.mxu0 %v2774_v45  ;;  %1066 = vmatprep.subr.mxu1 %v3218_v2  ;;  %3238 = vst [vmem:[#allocation13_spill] sm:$0xff] %v2788_v44  ;;  %v2795_v2 = vld [vmem:[%s3085_s1 + $0x40] sm:$0xff] }
 0x41f   :  { %996 = vmatpush1.msra.mxu0 %v2781_v51  ;;  %1067 = vmatpush1.msra.mxu1 %v3220_v5  ;;  %3239 = vst [vmem:[#allocation7_spill] sm:$0xff] %v2795_v2  ;;  %v2802_v5 = vld [vmem:[%s3085_s1 + $0x28] sm:$0xff] }
 0x420   :  { %997 = vmatprep.subr.mxu0 %v2788_v44  ;;  %1068 = vmatprep.subr.mxu1 %v3222_v7  ;;  %3240 = vst [vmem:[#allocation15_spill] sm:$0xff] %v2802_v5  ;;  %v2809_v7 = vld [vmem:[%s3085_s1 + $0x20] sm:$0xff] }
 0x421   :  { %998 = vmatpush1.msra.mxu0 %v2795_v2  ;;  %1069 = vmatpush1.msra.mxu1 %v3224_v10  ;;  %3241 = vst [vmem:[#allocation8_spill] sm:$0xff] %v2809_v7  ;;  %v2816_v10 = vld [vmem:[%s3085_s1 + $0x8] sm:$0xff] }
 0x422   :  { %999 = vmatprep.subr.mxu0 %v2802_v5  ;;  %1070 = vmatprep.subr.mxu1 %v3226_v12  ;;  %3242 = vst [vmem:[#allocation17_spill] sm:$0xff] %v2816_v10  ;;  %v2823_v12 = vld [vmem:[%s3085_s1] sm:$0xff] }
 0x423   :  { %1000 = vmatpush1.msra.mxu0 %v2809_v7  ;;  %1071 = vmatpush1.msra.mxu1 %v3228_v14  ;;  %3243 = vst [vmem:[#allocation9_spill] sm:$0xff] %v2823_v12  ;;  %v2833_v14 = vld [vmem:[%s3085_s1 + $0x1f8] sm:$0xff] }
 0x424   :  { %1001 = vmatprep.subr.mxu0 %v2816_v10  ;;  %1072 = vmatprep.subr.mxu1 %v3230_v16  ;;  %3244 = vst [vmem:[#allocation18_spill] sm:$0xff] %v2833_v14  ;;  %v1530_v16 = vld [vmem:[%s3086_s0 + $0x80] sm:$0xff]  ;;  %v1532_v10 = vld [vmem:[%s3086_s0 + $0x90] sm:$0xff] }
 0x425   :  { %1002 = vmatpush1.msra.mxu0 %v2823_v12  ;;  %1035 = vmatprep.mubr.f32.mxu0 %v3232_v18 }
 0x426   :  { %1073 = vmatpush1.msra.mxu1 %v3233_v19  ;;  %1106 = vmatprep.mubr.f32.mxu1 %v3232_v18  ;;  %v1531_v19 = vld [vmem:[%s3086_s0 + $0x88] sm:$0xff] }
 0x427   :  { %1148 = vmatprep.subr.mxu0 %v2482_v20  ;;  %1219 = vmatprep.subr.mxu1 %v2833_v14  ;;  %v1533_v14 = vld [vmem:[%s3086_s0 + $0x98] sm:$0xff] }
 0x4c6   :  { %v860_v47 = vpop.f32.mrf.mxu0  ;;  %v931_v63 = vpop.f32.mrf.mxu1 }
 0x4c7   :  { %v936_v49 = vadd.f32 %v1530_v16, %v860_v47  ;;  %v938_v16 = vadd.f32 %v1532_v10, %v931_v63  ;;  %v2922_v63 = vld [vmem:[%s3085_s1 + $0x70] sm:$0xff] }
 0x4c8   :  { %v862_v46 = vpop.f32.mrf.mxu0  ;;  %v933_v18 = vpop.f32.mrf.mxu1  ;;  %3246 = vst [vmem:[#allocation19_spill] sm:$0xff] %v2922_v63 }
 0x4c9   :  { %v1534_v61 = vmul.f32 -1.442695, %v936_v49  ;;  %v937_v58 = vadd.f32 %v1531_v19, %v862_v46  ;;  %v939_v12 = vadd.f32 %v1533_v14, %v933_v18 }
 0x4cb   :  { %1627 = vpow2.f32 %v1534_v61  ;;  %v1535_v20 = vmul.f32 -1.442695, %v937_v58  ;;  %v1536_v7 = vmul.f32 -1.442695, %v939_v12  ;;  %v2915_v12 = vld [vmem:[%s3085_s1 + $0x78] sm:$0xff] }
 0x4cc   :  { %3245 = vst [vmem:[#allocation10_spill] sm:$0xff] %v2915_v12 }
 0x4cd   :  { %1629 = vpow2.f32 %v1535_v20 }
 0x4ce   :  { %1631 = vpow2.f32 %v1536_v7 }
 0x4d8   :  { %v1628_v5 = vpop.eup %1627 }
 0x4d9   :  { %v943_v47 = vadd.f32 1.0, %v1628_v5 }
 0x4da   :  { %v1630_v49 = vpop.eup %1629 }
 0x4db   :  { %1633 = vrcp.f32 %v943_v47  ;;  %v949_v19 = vadd.f32 1.0, %v1630_v49  ;;  %v1632_v20 = vpop.eup %1631  ;;  %v2929_v47 = vld [vmem:[%s3085_s1 + $0x58] sm:$0xff] }
 0x4dc   :  { %1635 = vtanh.f32 %v938_v16  ;;  %v956_v2 = vadd.f32 1.0, %v1632_v20  ;;  %v3247_v16 = vld [vmem:[#allocation13_spill] sm:$0xff]  ;;  %3248 = vst [vmem:[#allocation12_spill] sm:$0xff] %v2929_v47  ;;  %v3249_v49 = vld [vmem:[#allocation7_spill] sm:$0xff] }
 0x4dd   :  { %1637 = vrcp.f32 %v949_v19  ;;  %v2936_v19 = vld [vmem:[%s3085_s1 + $0x50] sm:$0xff]  ;;  %v3251_v20 = vld [vmem:[#allocation15_spill] sm:$0xff] }
 0x4de   :  { %1639 = vrcp.f32 %v956_v2  ;;  %v2908_v2 = vld [vmem:[%s3085_s1 + $0x90] sm:$0xff]  ;;  %3250 = vst [vmem:[#allocation20_spill] sm:$0xff] %v2936_v19 }
 0x4e8   :  { %v1634_v46 = vpop.eup %1633 }
 0x4e9   :  { %v1636_v61 = vpop.eup %1635 }
 0x4ea   :  { %v1638_v58 = vpop.eup %1637  ;;  %v960_v18 = vmul.f32 %v1636_v61, %v1634_v46  ;;  %v2943_v46 = vld [vmem:[%s3085_s1 + $0x38] sm:$0xff]  ;;  %v3253_v61 = vld [vmem:[#allocation8_spill] sm:$0xff] }
 0x4eb   :  { %v959_v14 = vmul.f32 %v1638_v58, %v2499_v55  ;;  %v1640_v5 = vpop.eup %1639  ;;  %v2901_v55 = vld [vmem:[%s3085_s1 + $0x98] sm:$0xff]  ;;  %3252 = vst [vmem:[#allocation14_spill] sm:$0xff] %v2943_v46  ;;  %v2950_v58 = vld [vmem:[%s3085_s1 + $0x30] sm:$0xff] }
 0x4ec   :  { %3254 = vst [vmem:[#allocation21_spill] sm:$0xff] %v2950_v58 }
 0x4ed   :  { %v2849_v44 = vadd.f32 %v960_v18, %v959_v14  ;;  %v3255_v18 = vld [vmem:[#allocation17_spill] sm:$0xff]  ;;  %v2957_v14 = vld [vmem:[%s3085_s1 + $0x18] sm:$0xff] }
 0x4ee   :  { %3256 = vst [vmem:[#allocation16_spill] sm:$0xff] %v2957_v14 }
 0x4ef   :  { %1641 = vtanh.f32 %v2849_v44 }
 0x4fc   :  { %v1642_v10 = vpop.eup %1641 }
 0x4fd   :  { %v963_v7 = vmul.f32 %v1642_v10, %v1640_v5  ;;  %v3257_v5 = vld [vmem:[#allocation9_spill] sm:$0xff]  ;;  %v3258_v10 = vmov 0.0  }
 0x4ff   :  { %1537 = vst [vmem:[%s3087_s2 + $0x20] sm:$0xff] %v963_v7  ;;  %1036 = vmatmul.mubr.f32.vlgmr.msra.gmra.mxu0 %v963_v7  ;;  %1107 = vmatmul.mubr.f32.vlgmr.msra.gmra.mxu1 %v963_v7  ;;  %v2965_v7 = vld [vmem:[%s3085_s1 + $0x10] sm:$0xff] }
 0x500   :  { %1149 = vmatpush1.msra.mxu0 %v2508_v9  ;;  %1220 = vmatpush1.msra.mxu1 %v2514_v53  ;;  %3259 = vst [vmem:[#allocation22_spill] sm:$0xff] %v2965_v7 }
 0x501   :  { %1150 = vmatprep.subr.mxu0 %v2520_v57  ;;  %1221 = vmatprep.subr.mxu1 %v2526_v62 }
 0x502   :  { %1151 = vmatpush1.msra.mxu0 %v2532_v0  ;;  %1222 = vmatpush1.msra.mxu1 %v2538_v56 }
 0x503   :  { %1152 = vmatprep.subr.mxu0 %v2544_v3  ;;  %1223 = vmatprep.subr.mxu1 %v2550_v59 }
 0x504   :  { %1153 = vmatpush1.msra.mxu0 %v2556_v54  ;;  %1224 = vmatpush1.msra.mxu1 %v2562_v52 }
 0x505   :  { %1154 = vmatprep.subr.mxu0 %v2568_v60  ;;  %1225 = vmatprep.subr.mxu1 %v2574_v48 }
 0x506   :  { %1155 = vmatpush1.msra.mxu0 %v2580_v50  ;;  %1226 = vmatpush1.msra.mxu1 %v2586_v1 }
 0x507   :  { %1156 = vmatprep.subr.mxu0 %v2592_v4  ;;  %1227 = vmatprep.subr.mxu1 %v2598_v6 }
 0x508   :  { %1157 = vmatpush1.msra.mxu0 %v2604_v8  ;;  %1228 = vmatpush1.msra.mxu1 %v2610_v11 }
 0x509   :  { %1158 = vmatprep.subr.mxu0 %v2616_v13  ;;  %1229 = vmatprep.subr.mxu1 %v2622_v15 }
 0x50a   :  { %1159 = vmatpush1.msra.mxu0 %v2628_v17  ;;  %1230 = vmatpush1.msra.mxu1 %v2634_v21 }
 0x50b   :  { %1160 = vmatprep.subr.mxu0 %v2640_v22  ;;  %1231 = vmatprep.subr.mxu1 %v2646_v23 }
 0x50c   :  { %1161 = vmatpush1.msra.mxu0 %v2652_v24  ;;  %1232 = vmatpush1.msra.mxu1 %v2658_v25 }
 0x50d   :  { %1162 = vmatprep.subr.mxu0 %v2664_v26  ;;  %1233 = vmatprep.subr.mxu1 %v2670_v27 }
 0x50e   :  { %1163 = vmatpush1.msra.mxu0 %v2676_v28  ;;  %1234 = vmatpush1.msra.mxu1 %v2682_v29 }
 0x50f   :  { %1164 = vmatprep.subr.mxu0 %v2688_v30  ;;  %1235 = vmatprep.subr.mxu1 %v2694_v31 }
 0x510   :  { %1165 = vmatpush1.msra.mxu0 %v2700_v32  ;;  %1236 = vmatpush1.msra.mxu1 %v2706_v33 }
 0x511   :  { %1166 = vmatprep.subr.mxu0 %v2712_v34  ;;  %1237 = vmatprep.subr.mxu1 %v2718_v35 }
 0x512   :  { %1167 = vmatpush1.msra.mxu0 %v2724_v36  ;;  %1238 = vmatpush1.msra.mxu1 %v2730_v37 }
 0x513   :  { %1168 = vmatprep.subr.mxu0 %v2736_v38  ;;  %1239 = vmatprep.subr.mxu1 %v2742_v39 }
 0x514   :  { %1169 = vmatpush1.msra.mxu0 %v2748_v40  ;;  %1240 = vmatpush1.msra.mxu1 %v2754_v41 }
 0x515   :  { %1170 = vmatprep.subr.mxu0 %v2760_v42  ;;  %1241 = vmatprep.subr.mxu1 %v2901_v55 }
 0x516   :  { %1171 = vmatpush1.msra.mxu0 %v2767_v43  ;;  %1242 = vmatpush1.msra.mxu1 %v2908_v2 }
 0x517   :  { %1172 = vmatprep.subr.mxu0 %v2774_v45  ;;  %1243 = vmatprep.subr.mxu1 %v2915_v12 }
 0x518   :  { %1173 = vmatpush1.msra.mxu0 %v2781_v51  ;;  %1244 = vmatpush1.msra.mxu1 %v2922_v63 }
 0x519   :  { %1174 = vmatprep.subr.mxu0 %v3247_v16  ;;  %1245 = vmatprep.subr.mxu1 %v2929_v47  ;;  %v1540_v16 = vld [vmem:[%s3086_s0 + $0xb0] sm:$0xff] }
 0x51a   :  { %1175 = vmatpush1.msra.mxu0 %v3249_v49  ;;  %1246 = vmatpush1.msra.mxu1 %v2936_v19 }
 0x51b   :  { %1176 = vmatprep.subr.mxu0 %v3251_v20  ;;  %1247 = vmatprep.subr.mxu1 %v2943_v46 }
 0x51c   :  { %1177 = vmatpush1.msra.mxu0 %v3253_v61  ;;  %1248 = vmatpush1.msra.mxu1 %v2950_v58  ;;  %v3261_v58 = vld [vmem:[#allocation18_spill] sm:$0xff]  ;;  %v1539_v61 = vld [vmem:[%s3086_s0 + $0xa8] sm:$0xff] }
 0x51d   :  { %1178 = vmatprep.subr.mxu0 %v3255_v18  ;;  %1249 = vmatprep.subr.mxu1 %v2957_v14  ;;  %v3260_v18 = vld [vmem:[#allocation11_spill] sm:$0xff]  ;;  %v1538_v14 = vld [vmem:[%s3086_s0 + $0xa0] sm:$0xff] }
 0x51e   :  { %1179 = vmatpush1.msra.mxu0 %v3257_v5  ;;  %1212 = vmatprep.mubr.f32.mxu0 %v3258_v10 }
 0x51f   :  { %1250 = vmatpush1.msra.mxu1 %v2965_v7  ;;  %1283 = vmatprep.mubr.f32.mxu1 %v3258_v10 }
 0x520   :  { %1325 = vmatprep.subr.mxu0 %v3260_v18  ;;  %1396 = vmatprep.subr.mxu1 %v3261_v58  ;;  %v1541_v58 = vld [vmem:[%s3086_s0 + $0xb8] sm:$0xff] }
 0x5bf   :  { %v1037_v5 = vpop.f32.mrf.mxu0  ;;  %v1108_v7 = vpop.f32.mrf.mxu1 }
 0x5c0   :  { %v1113_v46 = vadd.f32 %v1538_v14, %v1037_v5  ;;  %v1115_v14 = vadd.f32 %v1540_v16, %v1108_v7 }
 0x5c1   :  { %v1039_v20 = vpop.f32.mrf.mxu0  ;;  %v1110_v18 = vpop.f32.mrf.mxu1 }
 0x5c2   :  { %v1542_v19 = vmul.f32 -1.442695, %v1113_v46  ;;  %v1114_v49 = vadd.f32 %v1539_v61, %v1039_v20  ;;  %v1116_v47 = vadd.f32 %v1541_v58, %v1110_v18 }
 0x5c4   :  { %1643 = vpow2.f32 %v1542_v19  ;;  %v1543_v10 = vmul.f32 -1.442695, %v1114_v49  ;;  %v1544_v63 = vmul.f32 -1.442695, %v1116_v47 }
 0x5c6   :  { %1645 = vpow2.f32 %v1543_v10 }
 0x5c7   :  { %1647 = vpow2.f32 %v1544_v63 }
 0x5d1   :  { %v1644_v51 = vpop.eup %1643 }
 0x5d2   :  { %v1120_v5 = vadd.f32 1.0, %v1644_v51 }
 0x5d3   :  { %v1646_v46 = vpop.eup %1645 }
 0x5d4   :  { %1649 = vrcp.f32 %v1120_v5  ;;  %v1126_v19 = vadd.f32 1.0, %v1646_v46  ;;  %v1648_v49 = vpop.eup %1647 }
 0x5d5   :  { %1651 = vtanh.f32 %v1115_v14  ;;  %v1133_v12 = vadd.f32 1.0, %v1648_v49 }
 0x5d6   :  { %1653 = vrcp.f32 %v1126_v19 }
 0x5d7   :  { %1655 = vrcp.f32 %v1133_v12  ;;  %v1554_v12 = vld [vmem:[%s3086_s0 + $0xe0] sm:$0xff] }
 0x5e1   :  { %v1650_v20 = vpop.eup %1649 }
 0x5e2   :  { %v1652_v61 = vpop.eup %1651 }
 0x5e3   :  { %v1654_v10 = vpop.eup %1653  ;;  %v1137_v58 = vmul.f32 %v1652_v61, %v1650_v20  ;;  %v1557_v20 = vld [vmem:[%s3086_s0 + $0xf8] sm:$0xff] }
 0x5e4   :  { %v1136_v18 = vmul.f32 %v1654_v10, %v2849_v44  ;;  %v1656_v51 = vpop.eup %1655 }
 0x5e6   :  { %v2984_v45 = vadd.f32 %v1137_v58, %v1136_v18  ;;  %v1556_v58 = vld [vmem:[%s3086_s0 + $0xf0] sm:$0xff] }
 0x5e8   :  { %1657 = vtanh.f32 %v2984_v45 }
 0x5f5   :  { %v1658_v16 = vpop.eup %1657 }
 0x5f6   :  { %v1140_v63 = vmul.f32 %v1658_v16, %v1656_v51 }
 0x5f8   :  { %1545 = vst [vmem:[%s3087_s2 + $0x28] sm:$0xff] %v1140_v63  ;;  %1213 = vmatmul.mubr.f32.vlgmr.msra.gmra.mxu0 %v1140_v63  ;;  %1284 = vmatmul.mubr.f32.vlgmr.msra.gmra.mxu1 %v1140_v63 }
 0x5f9   :  { %1326 = vmatpush1.msra.mxu0 %v2508_v9  ;;  %1397 = vmatpush1.msra.mxu1 %v2514_v53  ;;  %v3262_v9 = vld [vmem:[#allocation4_spill] sm:$0xff]  ;;  %v3263_v53 = vld [vmem:[#allocation10_spill] sm:$0xff] }
 0x5fa   :  { %1327 = vmatprep.subr.mxu0 %v2520_v57  ;;  %1398 = vmatprep.subr.mxu1 %v2526_v62  ;;  %v3264_v57 = vld [vmem:[#allocation6_spill] sm:$0xff]  ;;  %v3265_v62 = vld [vmem:[#allocation19_spill] sm:$0xff] }
 0x5fb   :  { %1328 = vmatpush1.msra.mxu0 %v2532_v0  ;;  %1399 = vmatpush1.msra.mxu1 %v2538_v56  ;;  %v3266_v0 = vld [vmem:[#allocation13_spill] sm:$0xff]  ;;  %v3267_v56 = vld [vmem:[#allocation12_spill] sm:$0xff] }
 0x5fc   :  { %1329 = vmatprep.subr.mxu0 %v2544_v3  ;;  %1400 = vmatprep.subr.mxu1 %v2550_v59  ;;  %v3268_v3 = vld [vmem:[#allocation7_spill] sm:$0xff]  ;;  %v3269_v59 = vld [vmem:[#allocation20_spill] sm:$0xff] }
 0x5fd   :  { %1330 = vmatpush1.msra.mxu0 %v2556_v54  ;;  %1401 = vmatpush1.msra.mxu1 %v2562_v52  ;;  %v3270_v54 = vld [vmem:[#allocation15_spill] sm:$0xff]  ;;  %v3271_v52 = vld [vmem:[#allocation14_spill] sm:$0xff] }
 0x5fe   :  { %1331 = vmatprep.subr.mxu0 %v2568_v60  ;;  %1402 = vmatprep.subr.mxu1 %v2574_v48  ;;  %v3272_v60 = vld [vmem:[#allocation8_spill] sm:$0xff]  ;;  %v3273_v48 = vld [vmem:[#allocation21_spill] sm:$0xff] }
 0x5ff   :  { %1332 = vmatpush1.msra.mxu0 %v2580_v50  ;;  %1403 = vmatpush1.msra.mxu1 %v2586_v1  ;;  %v3274_v50 = vld [vmem:[#allocation17_spill] sm:$0xff]  ;;  %v3275_v1 = vld [vmem:[#allocation16_spill] sm:$0xff] }
 0x600   :  { %1333 = vmatprep.subr.mxu0 %v2592_v4  ;;  %1404 = vmatprep.subr.mxu1 %v2598_v6  ;;  %v3276_v4 = vld [vmem:[#allocation9_spill] sm:$0xff]  ;;  %v3277_v6 = vmov 0.0  }
 0x601   :  { %1334 = vmatpush1.msra.mxu0 %v2604_v8  ;;  %1405 = vmatpush1.msra.mxu1 %v2610_v11  ;;  %v3278_v8 = vld [vmem:[#allocation22_spill] sm:$0xff]  ;;  %v1546_v11 = vld [vmem:[%s3086_s0 + $0xc0] sm:$0xff] }
 0x602   :  { %1335 = vmatprep.subr.mxu0 %v2616_v13  ;;  %1406 = vmatprep.subr.mxu1 %v2622_v15  ;;  %v1547_v15 = vld [vmem:[%s3086_s0 + $0xc8] sm:$0xff] }
 0x603   :  { %1336 = vmatpush1.msra.mxu0 %v2628_v17  ;;  %1407 = vmatpush1.msra.mxu1 %v2634_v21 }
 0x604   :  { %1337 = vmatprep.subr.mxu0 %v2640_v22  ;;  %1408 = vmatprep.subr.mxu1 %v2646_v23 }
 0x605   :  { %1338 = vmatpush1.msra.mxu0 %v2652_v24  ;;  %1409 = vmatpush1.msra.mxu1 %v2658_v25 }
 0x606   :  { %1339 = vmatprep.subr.mxu0 %v2664_v26  ;;  %1410 = vmatprep.subr.mxu1 %v2670_v27  ;;  %v1549_v26 = vld [vmem:[%s3086_s0 + $0xd8] sm:$0xff] }
 0x607   :  { %1340 = vmatpush1.msra.mxu0 %v2676_v28  ;;  %1411 = vmatpush1.msra.mxu1 %v2682_v29  ;;  %v1548_v29 = vld [vmem:[%s3086_s0 + $0xd0] sm:$0xff] }
 0x608   :  { %1341 = vmatprep.subr.mxu0 %v2688_v30  ;;  %1412 = vmatprep.subr.mxu1 %v2694_v31 }
 0x609   :  { %1342 = vmatpush1.msra.mxu0 %v2700_v32  ;;  %1413 = vmatpush1.msra.mxu1 %v2706_v33 }
 0x60a   :  { %1343 = vmatprep.subr.mxu0 %v2712_v34  ;;  %1414 = vmatprep.subr.mxu1 %v2718_v35 }
 0x60b   :  { %1344 = vmatpush1.msra.mxu0 %v2724_v36  ;;  %1415 = vmatpush1.msra.mxu1 %v2730_v37 }
 0x60c   :  { %1345 = vmatprep.subr.mxu0 %v2736_v38  ;;  %1416 = vmatprep.subr.mxu1 %v2742_v39 }
 0x60d   :  { %1346 = vmatpush1.msra.mxu0 %v2748_v40  ;;  %1417 = vmatpush1.msra.mxu1 %v2754_v41 }
 0x60e   :  { %1347 = vmatprep.subr.mxu0 %v2760_v42  ;;  %1418 = vmatprep.subr.mxu1 %v2901_v55 }
 0x60f   :  { %1348 = vmatpush1.msra.mxu0 %v2767_v43  ;;  %1419 = vmatpush1.msra.mxu1 %v2908_v2 }
 0x610   :  { %1349 = vmatprep.subr.mxu0 %v3262_v9  ;;  %1420 = vmatprep.subr.mxu1 %v3263_v53 }
 0x611   :  { %1350 = vmatpush1.msra.mxu0 %v3264_v57  ;;  %1421 = vmatpush1.msra.mxu1 %v3265_v62 }
 0x612   :  { %1351 = vmatprep.subr.mxu0 %v3266_v0  ;;  %1422 = vmatprep.subr.mxu1 %v3267_v56 }
 0x613   :  { %1352 = vmatpush1.msra.mxu0 %v3268_v3  ;;  %1423 = vmatpush1.msra.mxu1 %v3269_v59 }
 0x614   :  { %1353 = vmatprep.subr.mxu0 %v3270_v54  ;;  %1424 = vmatprep.subr.mxu1 %v3271_v52 }
 0x615   :  { %1354 = vmatpush1.msra.mxu0 %v3272_v60  ;;  %1425 = vmatpush1.msra.mxu1 %v3273_v48 }
 0x616   :  { %1355 = vmatprep.subr.mxu0 %v3274_v50  ;;  %1426 = vmatprep.subr.mxu1 %v3275_v1 }
 0x617   :  { %1356 = vmatpush1.msra.mxu0 %v3276_v4  ;;  %1389 = vmatprep.mubr.f32.mxu0 %v3277_v6 }
 0x618   :  { %1427 = vmatpush1.msra.mxu1 %v3278_v8  ;;  %1460 = vmatprep.mubr.f32.mxu1 %v3277_v6 }
 0x6b8   :  { %v1214_v13 = vpop.f32.mrf.mxu0  ;;  %v1285_v24 = vpop.f32.mrf.mxu1 }
 0x6b9   :  { %v1290_v17 = vadd.f32 %v1546_v11, %v1214_v13  ;;  %v1292_v32 = vadd.f32 %v1548_v29, %v1285_v24 }
 0x6ba   :  { %v1216_v21 = vpop.f32.mrf.mxu0  ;;  %v1287_v27 = vpop.f32.mrf.mxu1 }
 0x6bb   :  { %v1550_v22 = vmul.f32 -1.442695, %v1290_v17  ;;  %v1291_v23 = vadd.f32 %v1547_v15, %v1216_v21  ;;  %v1293_v28 = vadd.f32 %v1549_v26, %v1287_v27 }
 0x6bd   :  { %1659 = vpow2.f32 %v1550_v22  ;;  %v1551_v25 = vmul.f32 -1.442695, %v1291_v23  ;;  %v1552_v30 = vmul.f32 -1.442695, %v1293_v28 }
 0x6bf   :  { %1661 = vpow2.f32 %v1551_v25 }
 0x6c0   :  { %1663 = vpow2.f32 %v1552_v30 }
 0x6ca   :  { %v1660_v31 = vpop.eup %1659 }
 0x6cb   :  { %v1297_v33 = vadd.f32 1.0, %v1660_v31 }
 0x6cc   :  { %v1662_v34 = vpop.eup %1661 }
 0x6cd   :  { %1665 = vrcp.f32 %v1297_v33  ;;  %v1303_v35 = vadd.f32 1.0, %v1662_v34  ;;  %v1664_v36 = vpop.eup %1663 }
 0x6ce   :  { %1667 = vtanh.f32 %v1292_v32  ;;  %v1310_v40 = vadd.f32 1.0, %v1664_v36 }
 0x6cf   :  { %1669 = vrcp.f32 %v1303_v35 }
 0x6d0   :  { %1671 = vrcp.f32 %v1310_v40 }
 0x6da   :  { %v1666_v37 = vpop.eup %1665 }
 0x6db   :  { %v1668_v38 = vpop.eup %1667 }
 0x6dc   :  { %v1670_v39 = vpop.eup %1669  ;;  %v1314_v41 = vmul.f32 %v1668_v38, %v1666_v37 }
 0x6dd   :  { %v1313_v42 = vmul.f32 %v1670_v39, %v2984_v45  ;;  %v1672_v44 = vpop.eup %1671  ;;  %v1555_v45 = vld [vmem:[%s3086_s0 + $0xe8] sm:$0xff] }
 0x6df   :  { %v1315_v43 = vadd.f32 %v1314_v41, %v1313_v42 }
 0x6e1   :  { %1673 = vtanh.f32 %v1315_v43 }
 0x6ee   :  { %v1674_v55 = vpop.eup %1673 }
 0x6ef   :  { %v1317_v2 = vmul.f32 %v1674_v55, %v1672_v44 }
 0x6f1   :  { %1553 = vst [vmem:[%s3087_s2 + $0x30] sm:$0xff] %v1317_v2  ;;  %1390 = vmatmul.mubr.f32.vlgmr.msra.gmra.mxu0 %v1317_v2  ;;  %1461 = vmatmul.mubr.f32.vlgmr.msra.gmra.mxu1 %v1317_v2 }
 0x7b1   :  { %v1391_v47 = vpop.f32.mrf.mxu0  ;;  %v1462_v19 = vpop.f32.mrf.mxu1 }
 0x7b2   :  { %v1467_v7 = vadd.f32 %v1554_v12, %v1391_v47  ;;  %v1469_v16 = vadd.f32 %v1556_v58, %v1462_v19 }
 0x7b3   :  { %v1393_v14 = vpop.f32.mrf.mxu0  ;;  %v1464_v61 = vpop.f32.mrf.mxu1 }
 0x7b4   :  { %v1558_v5 = vmul.f32 -1.442695, %v1467_v7  ;;  %v1468_v46 = vadd.f32 %v1555_v45, %v1393_v14  ;;  %v1470_v10 = vadd.f32 %v1557_v20, %v1464_v61 }
 0x7b6   :  { %1675 = vpow2.f32 %v1558_v5  ;;  %v1559_v49 = vmul.f32 -1.442695, %v1468_v46  ;;  %v1560_v18 = vmul.f32 -1.442695, %v1470_v10 }
 0x7b8   :  { %1677 = vpow2.f32 %v1559_v49 }
 0x7b9   :  { %1679 = vpow2.f32 %v1560_v18 }
 0x7c3   :  { %v1676_v51 = vpop.eup %1675 }
 0x7c4   :  { %v1474_v63 = vadd.f32 1.0, %v1676_v51 }
 0x7c5   :  { %v1678_v9 = vpop.eup %1677 }
 0x7c6   :  { %1681 = vrcp.f32 %v1474_v63  ;;  %v1480_v53 = vadd.f32 1.0, %v1678_v9  ;;  %v1680_v57 = vpop.eup %1679 }
 0x7c7   :  { %1683 = vtanh.f32 %v1469_v16  ;;  %v1487_v3 = vadd.f32 1.0, %v1680_v57 }
 0x7c8   :  { %1685 = vrcp.f32 %v1480_v53 }
 0x7c9   :  { %1687 = vrcp.f32 %v1487_v3 }
 0x7d3   :  { %v1682_v62 = vpop.eup %1681 }
 0x7d4   :  { %v1684_v0 = vpop.eup %1683 }
 0x7d5   :  { %v1686_v56 = vpop.eup %1685  ;;  %v1491_v59 = vmul.f32 %v1684_v0, %v1682_v62 }
 0x7d6   :  { %v1490_v54 = vmul.f32 %v1686_v56, %v1315_v43  ;;  %v1688_v60 = vpop.eup %1687 }
 0x7d8   :  { %v1492_v52 = vadd.f32 %v1491_v59, %v1490_v54 }
 0x7da   :  { %1689 = vtanh.f32 %v1492_v52 }
 0x7e7   :  { %v1690_v48 = vpop.eup %1689 }
 0x7e8   :  { %v1494_v50 = vmul.f32 %v1690_v48, %v1688_v60 }
 0x7ea   :  { %1561 = vst [vmem:[%s3087_s2 + $0x38] sm:$0xff] %v1494_v50 }

</bundles_post_ra>
